<compile_context>
chip_gen: v7x
topology: tpu7x:2x2x1
jax: 0.10.0
libtpu: 0.0.40
codegen_flags: <defaults>
</compile_context>

<pallas_src>
import numpy as np
import jax
import jax.numpy as jnp
from jax import lax
from jax.experimental import pallas as pl
from jax.experimental.pallas import tpu as pltpu

BN_EPS = 1e-5
KS = 3            # conv kernel size
KK = KS * KS      # 9 taps
LANE = 128        # TPU lane width
SUB = 8           # f32 sublane tile


def _round_up(x, m):
    return (x + m - 1) // m * m


def _tap_masks(n, h, w, m_pad):
    """(9, m_pad) 0/1 f32 tap-validity masks for pad=1 3x3 conv.

    Lane m < n*h*w encodes pixel (b, i, j) of the flattened batch; tap
    t = ky*3 + kx is valid iff (i+ky-1, j+kx-1) is inside the image.
    Lanes >= n*h*w (lane padding) are always 0.
    """
    m_true = n * h * w
    masks = np.zeros((KK, m_pad), np.float32)
    idx = np.arange(m_true)
    i = (idx // w) % h
    j = idx % w
    for t in range(KK):
        dy, dx = t // KS - 1, t % KS - 1
        valid = (i + dy >= 0) & (i + dy < h) & (j + dx >= 0) & (j + dx < w)
        masks[t, :m_true] = valid.astype(np.float32)
    return masks


def _decimation_matrix(n, h, w, stride, m_out_pad):
    """(n*h*w, m_out_pad) 0/1 f32: selects stride-decimated output pixels.

    Block-diagonal over the batch; columns >= n*ho*wo stay all-zero (lane pad).
    """
    ho = (h - 1) // stride + 1
    wo = (w - 1) // stride + 1
    d = np.zeros((n * h * w, m_out_pad), np.float32)
    for b in range(n):
        for io in range(ho):
            for jo in range(wo):
                d[b * h * w + io * stride * w + jo * stride,
                  b * ho * wo + io * wo + jo] = 1.0
    return d


def _fuse_weight(w_hwio, cin_pad, cout_pad):
    """(3,3,Cin,Cout) HWIO -> (Cout_pad, 9*Cin_pad) bf16, cols row = t*Cin_pad+c."""
    kh, kw, cin, cout = w_hwio.shape
    w = jnp.transpose(jnp.reshape(w_hwio, (kh * kw, cin, cout)), (2, 0, 1))
    w = jnp.pad(w, ((0, cout_pad - cout), (0, 0), (0, cin_pad - cin)))
    return jnp.reshape(w, (cout_pad, kh * kw * cin_pad)).astype(jnp.bfloat16)


def _make_fused_kernel(layer_cfgs, n_masks, n_decs):
    """Fused forward kernel. refs = (x, w0..w5, mask*, dec*, out)."""
    n_layers = len(layer_cfgs)

    def kernel(*refs):
        x_ref = refs[0]
        w_refs = refs[1:1 + n_layers]
        m_refs = refs[1 + n_layers:1 + n_layers + n_masks]
        d_refs = refs[1 + n_layers + n_masks:1 + n_layers + n_masks + n_decs]
        o_ref = refs[1 + n_layers + n_masks + n_decs]

        src = x_ref[...]                                 # (cin_pad0, m_pad0) f32
        for li, cfg in enumerate(layer_cfgs):
            w_in, m_in = cfg["w_in"], cfg["m_in"]
            mask_ref = m_refs[cfg["mask_idx"]]           # (9, m_in) 0/1

            # ---- whole-batch im2col: lane rolls (XLU) + validity masks (VPU).
            taps = []
            for t in range(KK):
                dy, dx = t // KS - 1, t % KS - 1
                s = dy * w_in + dx                       # lane offset of tap t
                shifted = src if s == 0 else pltpu.roll(src, shift=(-s) % m_in,
                                                        axis=1)
                taps.append(shifted * mask_ref[t:t + 1, :])
            # (9*cin_pad, m_in); 8-row blocks -> clean sublane concat.
            cols = jnp.concatenate(taps, axis=0).astype(jnp.bfloat16)

            # ---- single fused conv matmul, K = 9*cin_pad, f32 accumulation.
            y = jnp.dot(w_refs[li][...], cols,
                        preferred_element_type=jnp.float32)   # (cout_pad, m_in)

            # ---- stride-2: decimate the stride-1 output with a 0/1 matmul.
            if cfg["dec_idx"] is not None:
                y = jnp.dot(y, d_refs[cfg["dec_idx"]][...],
                            preferred_element_type=jnp.float32)  # (cout_pad, m_out)

            if cfg["bn"]:
                # BatchNorm2d training-mode batch stats (gamma=1, beta=0),
                # two-pass centered variance over the n*ho*wo valid lanes.
                inv_cnt = 1.0 / float(cfg["bn_count"])
                mean = jnp.sum(y, axis=1, keepdims=True) * inv_cnt
                d = y - mean
                if cfg["needs_valid"]:
                    # zero padded lanes so they don't pollute the variance and
                    # stay exactly zero for the next layer.
                    d = d * m_refs[cfg["out_mask_idx"]][KK // 2:KK // 2 + 1, :]
                var = jnp.sum(d * d, axis=1, keepdims=True) * inv_cnt
                y = d * lax.rsqrt(var + BN_EPS)
            if cfg["relu"]:
                y = jnp.maximum(y, 0.0)

            src = y                                      # stays in registers/VMEM

        o_ref[...] = src                                 # (cout_pad_last, m_out)

    return kernel


def init_weightnet_params(key, in_channels, base_channels, out_channels=1):
    """Deterministic kaiming-uniform-style init for all conv weights (HWIO)."""
    specs = [
        ("conv0", in_channels, base_channels),
        ("conv1", base_channels, base_channels * 2),
        ("conv2", base_channels * 2, base_channels * 2),
        ("conv3", base_channels * 2, base_channels * 4),
        ("conv4", base_channels * 4, base_channels * 4),
        ("out", base_channels * 4, out_channels),
    ]
    params = {}
    for name, cin, cout in specs:
        key, sub = jax.random.split(key)
        fan_in = cin * KK
        bound = (6.0 / fan_in) ** 0.5
        params[name] = jax.random.uniform(
            sub, (KS, KS, cin, cout), jnp.float32, -bound, bound)
    return params


def weightnet_forward(params, x_nchw):
    """WeightNet.forward: (N, Cin, H, W) -> (N, out_channels, H/4, W/4)."""
    n, cin0, h, w = x_nchw.shape
    out_ch = params["out"].shape[3]

    # Static layer plan: (weight name, stride, bn+relu).
    plan = [("conv0", 1, True), ("conv1", 2, True), ("conv2", 1, True),
            ("conv3", 2, True), ("conv4", 1, True), ("out", 1, False)]

    masks, mask_idx = [], {}

    def get_mask_idx(hh, ww):
        key = (hh, ww)
        if key not in mask_idx:
            m_pad = _round_up(n * hh * ww, LANE)
            mask_idx[key] = len(masks)
            masks.append(jnp.asarray(_tap_masks(n, hh, ww, m_pad)))
        return mask_idx[key]

    decs, layer_cfgs, fused_w = [], [], []
    cur_h, cur_w = h, w
    for name, stride, bn_relu in plan:
        _, _, cin_l, cout_l = params[name].shape
        cin_pad = _round_up(cin_l, SUB)
        cout_pad = _round_up(cout_l, SUB)
        m_in = _round_up(n * cur_h * cur_w, LANE)
        in_mask = get_mask_idx(cur_h, cur_w)

        ho = (cur_h - 1) // stride + 1
        wo = (cur_w - 1) // stride + 1
        m_out = _round_up(n * ho * wo, LANE)
        dec_idx = None
        if stride != 1:
            dec_idx = len(decs)
            decs.append(jnp.asarray(
                _decimation_matrix(n, cur_h, cur_w, stride, m_out)))
        out_mask = get_mask_idx(ho, wo)

        layer_cfgs.append(dict(
            w_in=cur_w, m_in=m_in, m_out=m_out,
            mask_idx=in_mask, out_mask_idx=out_mask, dec_idx=dec_idx,
            bn=bn_relu, relu=bn_relu, bn_count=n * ho * wo,
            needs_valid=(m_out != n * ho * wo), cout_pad=cout_pad))
        fused_w.append(_fuse_weight(params[name], cin_pad, cout_pad))
        cur_h, cur_w = ho, wo

    # NCHW -> channel-major (Cin_pad, N*H*W): big dim on lanes, pad channels.
    cin_pad0 = _round_up(cin0, SUB)
    m0 = _round_up(n * h * w, LANE)
    x2d = jnp.reshape(jnp.transpose(x_nchw, (1, 0, 2, 3)), (cin0, n * h * w))
    x2d = jnp.pad(x2d, ((0, cin_pad0 - cin0), (0, m0 - n * h * w)))

    num_inputs = 1 + len(fused_w) + len(masks) + len(decs)
    out2d = pl.pallas_call(
        _make_fused_kernel(layer_cfgs, len(masks), len(decs)),
        out_shape=jax.ShapeDtypeStruct(
            (layer_cfgs[-1]["cout_pad"], layer_cfgs[-1]["m_out"]), jnp.float32),
        in_specs=[pl.BlockSpec(memory_space=pltpu.MemorySpace.VMEM)] * num_inputs,
        out_specs=pl.BlockSpec(memory_space=pltpu.MemorySpace.VMEM),
    )(x2d, *fused_w, *masks, *decs)

    # (cout_pad, m_out_pad) -> drop channel/lane padding -> (N, out_ch, Ho, Wo)
    out2d = out2d[:out_ch, :n * cur_h * cur_w]
    return jnp.transpose(jnp.reshape(out2d, (out_ch, n, cur_h, cur_w)),
                         (1, 0, 2, 3))


if __name__ == "__main__":
    key = jax.random.PRNGKey(0)
    key, xkey = jax.random.split(key)

    N, IN_CH, H, W = 2, 4, 16, 16
    BASE_CH, OUT_CH = 8, 1

    x = jax.random.normal(xkey, (N, IN_CH, H, W), jnp.float32)
    params = init_weightnet_params(key, IN_CH, BASE_CH, OUT_CH)

    y = jax.jit(weightnet_forward)(params, x)
    y = jax.block_until_ready(y)

    assert y.shape == (N, OUT_CH, H // 4, W // 4), y.shape
    assert bool(jnp.all(jnp.isfinite(y)))
    print("KERNEL_OK")
</pallas_src>

<mosaic_0001>
module attributes {stable_mosaic.version = 11 : i64} {
  func.func @kernel(%arg0: memref<8x512xf32, #tpu.memory_space<vmem>>, %arg1: memref<8x72xbf16, #tpu.memory_space<vmem>>, %arg2: memref<16x72xbf16, #tpu.memory_space<vmem>>, %arg3: memref<16x144xbf16, #tpu.memory_space<vmem>>, %arg4: memref<32x144xbf16, #tpu.memory_space<vmem>>, %arg5: memref<32x288xbf16, #tpu.memory_space<vmem>>, %arg6: memref<8x288xbf16, #tpu.memory_space<vmem>>, %arg7: memref<9x512xf32, #tpu.memory_space<vmem>>, %arg8: memref<9x128xf32, #tpu.memory_space<vmem>>, %arg9: memref<9x128xf32, #tpu.memory_space<vmem>>, %arg10: memref<512x128xf32, #tpu.memory_space<vmem>>, %arg11: memref<128x128xf32, #tpu.memory_space<vmem>>, %arg12: memref<8x128xf32, #tpu.memory_space<vmem>>) attributes {dimension_semantics = [], scalar_prefetch = 0 : i64, scratch_operands = 0 : i64, tpu.core_type = #tpu.core_type<tc>} {
    %c0 = arith.constant 0 : index
    %c0_0 = arith.constant 0 : index
    %0 = vector.load %arg0[%c0, %c0_0] : memref<8x512xf32, #tpu.memory_space<vmem>>, vector<8x512xf32>
    %c17_i32 = arith.constant 17 : i32
    %1 = tpu.dynamic_rotate %0 by %c17_i32 dim 1 : vector<8x512xf32>, i32 -> vector<8x512xf32>
    %c0_1 = arith.constant 0 : index
    %c0_2 = arith.constant 0 : index
    %2 = vector.load %arg7[%c0_1, %c0_2] : memref<9x512xf32, #tpu.memory_space<vmem>>, vector<1x512xf32>
    %3 = vector.broadcast %2 : vector<1x512xf32> to vector<8x512xf32>
    %4 = arith.mulf %1, %3 : vector<8x512xf32>
    %c16_i32 = arith.constant 16 : i32
    %5 = tpu.dynamic_rotate %0 by %c16_i32 dim 1 : vector<8x512xf32>, i32 -> vector<8x512xf32>
    %c1 = arith.constant 1 : index
    %c0_3 = arith.constant 0 : index
    %6 = vector.load %arg7[%c1, %c0_3] : memref<9x512xf32, #tpu.memory_space<vmem>>, vector<1x512xf32>
    %7 = vector.broadcast %6 : vector<1x512xf32> to vector<8x512xf32>
    %8 = arith.mulf %5, %7 : vector<8x512xf32>
    %c15_i32 = arith.constant 15 : i32
    %9 = tpu.dynamic_rotate %0 by %c15_i32 dim 1 : vector<8x512xf32>, i32 -> vector<8x512xf32>
    %c2 = arith.constant 2 : index
    %c0_4 = arith.constant 0 : index
    %10 = vector.load %arg7[%c2, %c0_4] : memref<9x512xf32, #tpu.memory_space<vmem>>, vector<1x512xf32>
    %11 = vector.broadcast %10 : vector<1x512xf32> to vector<8x512xf32>
    %12 = arith.mulf %9, %11 : vector<8x512xf32>
    %c1_i32 = arith.constant 1 : i32
    %13 = tpu.dynamic_rotate %0 by %c1_i32 dim 1 : vector<8x512xf32>, i32 -> vector<8x512xf32>
    %c3 = arith.constant 3 : index
    %c0_5 = arith.constant 0 : index
    %14 = vector.load %arg7[%c3, %c0_5] : memref<9x512xf32, #tpu.memory_space<vmem>>, vector<1x512xf32>
    %15 = vector.broadcast %14 : vector<1x512xf32> to vector<8x512xf32>
    %16 = arith.mulf %13, %15 : vector<8x512xf32>
    %c4 = arith.constant 4 : index
    %c0_6 = arith.constant 0 : index
    %17 = vector.load %arg7[%c4, %c0_6] : memref<9x512xf32, #tpu.memory_space<vmem>>, vector<1x512xf32>
    %18 = vector.broadcast %17 : vector<1x512xf32> to vector<8x512xf32>
    %19 = arith.mulf %0, %18 : vector<8x512xf32>
    %c511_i32 = arith.constant 511 : i32
    %20 = tpu.dynamic_rotate %0 by %c511_i32 dim 1 : vector<8x512xf32>, i32 -> vector<8x512xf32>
    %c5 = arith.constant 5 : index
    %c0_7 = arith.constant 0 : index
    %21 = vector.load %arg7[%c5, %c0_7] : memref<9x512xf32, #tpu.memory_space<vmem>>, vector<1x512xf32>
    %22 = vector.broadcast %21 : vector<1x512xf32> to vector<8x512xf32>
    %23 = arith.mulf %20, %22 : vector<8x512xf32>
    %c497_i32 = arith.constant 497 : i32
    %24 = tpu.dynamic_rotate %0 by %c497_i32 dim 1 : vector<8x512xf32>, i32 -> vector<8x512xf32>
    %c6 = arith.constant 6 : index
    %c0_8 = arith.constant 0 : index
    %25 = vector.load %arg7[%c6, %c0_8] : memref<9x512xf32, #tpu.memory_space<vmem>>, vector<1x512xf32>
    %26 = vector.broadcast %25 : vector<1x512xf32> to vector<8x512xf32>
    %27 = arith.mulf %24, %26 : vector<8x512xf32>
    %c496_i32 = arith.constant 496 : i32
    %28 = tpu.dynamic_rotate %0 by %c496_i32 dim 1 : vector<8x512xf32>, i32 -> vector<8x512xf32>
    %c7 = arith.constant 7 : index
    %c0_9 = arith.constant 0 : index
    %29 = vector.load %arg7[%c7, %c0_9] : memref<9x512xf32, #tpu.memory_space<vmem>>, vector<1x512xf32>
    %30 = vector.broadcast %29 : vector<1x512xf32> to vector<8x512xf32>
    %31 = arith.mulf %28, %30 : vector<8x512xf32>
    %c495_i32 = arith.constant 495 : i32
    %32 = tpu.dynamic_rotate %0 by %c495_i32 dim 1 : vector<8x512xf32>, i32 -> vector<8x512xf32>
    %c8 = arith.constant 8 : index
    %c0_10 = arith.constant 0 : index
    %33 = vector.load %arg7[%c8, %c0_10] : memref<9x512xf32, #tpu.memory_space<vmem>>, vector<1x512xf32>
    %34 = vector.broadcast %33 : vector<1x512xf32> to vector<8x512xf32>
    %35 = arith.mulf %32, %34 : vector<8x512xf32>
    %36 = tpu.concatenate %4, %8, %12, %16, %19, %23, %27, %31, %35 in 0 : vector<8x512xf32>, vector<8x512xf32>, vector<8x512xf32>, vector<8x512xf32>, vector<8x512xf32>, vector<8x512xf32>, vector<8x512xf32>, vector<8x512xf32>, vector<8x512xf32> -> vector<72x512xf32>
    %37 = arith.truncf %36 : vector<72x512xf32> to vector<72x512xbf16>
    %c0_11 = arith.constant 0 : index
    %c0_12 = arith.constant 0 : index
    %38 = vector.load %arg1[%c0_11, %c0_12] : memref<8x72xbf16, #tpu.memory_space<vmem>>, vector<8x72xbf16>
    %cst = arith.constant dense<0.000000e+00> : vector<8x512xf32>
    %39 = tpu.matmul %38, %37, %cst {dimension_numbers = #tpu.dot_dimension_numbers<[1], [0], [0], [1], [0, 0, 1, 1], [], []>} : vector<8x72xbf16>, vector<72x512xbf16>, vector<8x512xf32> -> vector<8x512xf32>
    %cst_13 = arith.constant dense<0.000000e+00> : vector<8xf32>
    %40 = vector.multi_reduction <add>, %39, %cst_13 [1] : vector<8x512xf32> to vector<8xf32>
    %41 = vector.shape_cast %40 : vector<8xf32> to vector<8x1xf32>
    %cst_14 = arith.constant 0.001953125 : f32
    %42 = vector.broadcast %cst_14 : f32 to vector<8x1xf32>
    %43 = arith.mulf %41, %42 : vector<8x1xf32>
    %44 = vector.broadcast %43 : vector<8x1xf32> to vector<8x512xf32>
    %45 = arith.subf %39, %44 : vector<8x512xf32>
    %46 = arith.mulf %45, %45 : vector<8x512xf32>
    %cst_15 = arith.constant dense<0.000000e+00> : vector<8xf32>
    %47 = vector.multi_reduction <add>, %46, %cst_15 [1] : vector<8x512xf32> to vector<8xf32>
    %48 = vector.shape_cast %47 : vector<8xf32> to vector<8x1xf32>
    %cst_16 = arith.constant 0.001953125 : f32
    %49 = vector.broadcast %cst_16 : f32 to vector<8x1xf32>
    %50 = arith.mulf %48, %49 : vector<8x1xf32>
    %cst_17 = arith.constant 9.99999974E-6 : f32
    %51 = vector.broadcast %cst_17 : f32 to vector<8x1xf32>
    %52 = arith.addf %50, %51 : vector<8x1xf32>
    %53 = math.rsqrt %52 : vector<8x1xf32>
    %54 = vector.broadcast %53 : vector<8x1xf32> to vector<8x512xf32>
    %55 = arith.mulf %45, %54 : vector<8x512xf32>
    %cst_18 = arith.constant 0.000000e+00 : f32
    %56 = vector.broadcast %cst_18 : f32 to vector<8x512xf32>
    %57 = arith.maximumf %55, %56 : vector<8x512xf32>
    %c17_i32_19 = arith.constant 17 : i32
    %58 = tpu.dynamic_rotate %57 by %c17_i32_19 dim 1 : vector<8x512xf32>, i32 -> vector<8x512xf32>
    %c0_20 = arith.constant 0 : index
    %c0_21 = arith.constant 0 : index
    %59 = vector.load %arg7[%c0_20, %c0_21] : memref<9x512xf32, #tpu.memory_space<vmem>>, vector<1x512xf32>
    %60 = vector.broadcast %59 : vector<1x512xf32> to vector<8x512xf32>
    %61 = arith.mulf %58, %60 : vector<8x512xf32>
    %c16_i32_22 = arith.constant 16 : i32
    %62 = tpu.dynamic_rotate %57 by %c16_i32_22 dim 1 : vector<8x512xf32>, i32 -> vector<8x512xf32>
    %c1_23 = arith.constant 1 : index
    %c0_24 = arith.constant 0 : index
    %63 = vector.load %arg7[%c1_23, %c0_24] : memref<9x512xf32, #tpu.memory_space<vmem>>, vector<1x512xf32>
    %64 = vector.broadcast %63 : vector<1x512xf32> to vector<8x512xf32>
    %65 = arith.mulf %62, %64 : vector<8x512xf32>
    %c15_i32_25 = arith.constant 15 : i32
    %66 = tpu.dynamic_rotate %57 by %c15_i32_25 dim 1 : vector<8x512xf32>, i32 -> vector<8x512xf32>
    %c2_26 = arith.constant 2 : index
    %c0_27 = arith.constant 0 : index
    %67 = vector.load %arg7[%c2_26, %c0_27] : memref<9x512xf32, #tpu.memory_space<vmem>>, vector<1x512xf32>
    %68 = vector.broadcast %67 : vector<1x512xf32> to vector<8x512xf32>
    %69 = arith.mulf %66, %68 : vector<8x512xf32>
    %c1_i32_28 = arith.constant 1 : i32
    %70 = tpu.dynamic_rotate %57 by %c1_i32_28 dim 1 : vector<8x512xf32>, i32 -> vector<8x512xf32>
    %c3_29 = arith.constant 3 : index
    %c0_30 = arith.constant 0 : index
    %71 = vector.load %arg7[%c3_29, %c0_30] : memref<9x512xf32, #tpu.memory_space<vmem>>, vector<1x512xf32>
    %72 = vector.broadcast %71 : vector<1x512xf32> to vector<8x512xf32>
    %73 = arith.mulf %70, %72 : vector<8x512xf32>
    %c4_31 = arith.constant 4 : index
    %c0_32 = arith.constant 0 : index
    %74 = vector.load %arg7[%c4_31, %c0_32] : memref<9x512xf32, #tpu.memory_space<vmem>>, vector<1x512xf32>
    %75 = vector.broadcast %74 : vector<1x512xf32> to vector<8x512xf32>
    %76 = arith.mulf %57, %75 : vector<8x512xf32>
    %c511_i32_33 = arith.constant 511 : i32
    %77 = tpu.dynamic_rotate %57 by %c511_i32_33 dim 1 : vector<8x512xf32>, i32 -> vector<8x512xf32>
    %c5_34 = arith.constant 5 : index
    %c0_35 = arith.constant 0 : index
    %78 = vector.load %arg7[%c5_34, %c0_35] : memref<9x512xf32, #tpu.memory_space<vmem>>, vector<1x512xf32>
    %79 = vector.broadcast %78 : vector<1x512xf32> to vector<8x512xf32>
    %80 = arith.mulf %77, %79 : vector<8x512xf32>
    %c497_i32_36 = arith.constant 497 : i32
    %81 = tpu.dynamic_rotate %57 by %c497_i32_36 dim 1 : vector<8x512xf32>, i32 -> vector<8x512xf32>
    %c6_37 = arith.constant 6 : index
    %c0_38 = arith.constant 0 : index
    %82 = vector.load %arg7[%c6_37, %c0_38] : memref<9x512xf32, #tpu.memory_space<vmem>>, vector<1x512xf32>
    %83 = vector.broadcast %82 : vector<1x512xf32> to vector<8x512xf32>
    %84 = arith.mulf %81, %83 : vector<8x512xf32>
    %c496_i32_39 = arith.constant 496 : i32
    %85 = tpu.dynamic_rotate %57 by %c496_i32_39 dim 1 : vector<8x512xf32>, i32 -> vector<8x512xf32>
    %c7_40 = arith.constant 7 : index
    %c0_41 = arith.constant 0 : index
    %86 = vector.load %arg7[%c7_40, %c0_41] : memref<9x512xf32, #tpu.memory_space<vmem>>, vector<1x512xf32>
    %87 = vector.broadcast %86 : vector<1x512xf32> to vector<8x512xf32>
    %88 = arith.mulf %85, %87 : vector<8x512xf32>
    %c495_i32_42 = arith.constant 495 : i32
    %89 = tpu.dynamic_rotate %57 by %c495_i32_42 dim 1 : vector<8x512xf32>, i32 -> vector<8x512xf32>
    %c8_43 = arith.constant 8 : index
    %c0_44 = arith.constant 0 : index
    %90 = vector.load %arg7[%c8_43, %c0_44] : memref<9x512xf32, #tpu.memory_space<vmem>>, vector<1x512xf32>
    %91 = vector.broadcast %90 : vector<1x512xf32> to vector<8x512xf32>
    %92 = arith.mulf %89, %91 : vector<8x512xf32>
    %93 = tpu.concatenate %61, %65, %69, %73, %76, %80, %84, %88, %92 in 0 : vector<8x512xf32>, vector<8x512xf32>, vector<8x512xf32>, vector<8x512xf32>, vector<8x512xf32>, vector<8x512xf32>, vector<8x512xf32>, vector<8x512xf32>, vector<8x512xf32> -> vector<72x512xf32>
    %94 = arith.truncf %93 : vector<72x512xf32> to vector<72x512xbf16>
    %c0_45 = arith.constant 0 : index
    %c0_46 = arith.constant 0 : index
    %95 = vector.load %arg2[%c0_45, %c0_46] : memref<16x72xbf16, #tpu.memory_space<vmem>>, vector<16x72xbf16>
    %cst_47 = arith.constant dense<0.000000e+00> : vector<16x512xf32>
    %96 = tpu.matmul %95, %94, %cst_47 {dimension_numbers = #tpu.dot_dimension_numbers<[1], [0], [0], [1], [0, 0, 1, 1], [], []>} : vector<16x72xbf16>, vector<72x512xbf16>, vector<16x512xf32> -> vector<16x512xf32>
    %c0_48 = arith.constant 0 : index
    %c0_49 = arith.constant 0 : index
    %97 = vector.load %arg10[%c0_48, %c0_49] : memref<512x128xf32, #tpu.memory_space<vmem>>, vector<512x128xf32>
    %cst_50 = arith.constant dense<0.000000e+00> : vector<16x128xf32>
    %98 = tpu.matmul %96, %97, %cst_50 {dimension_numbers = #tpu.dot_dimension_numbers<[1], [0], [0], [1], [0, 0, 1, 1], [], []>} : vector<16x512xf32>, vector<512x128xf32>, vector<16x128xf32> -> vector<16x128xf32>
    %cst_51 = arith.constant dense<0.000000e+00> : vector<16xf32>
    %99 = vector.multi_reduction <add>, %98, %cst_51 [1] : vector<16x128xf32> to vector<16xf32>
    %100 = vector.shape_cast %99 : vector<16xf32> to vector<16x1xf32>
    %cst_52 = arith.constant 7.812500e-03 : f32
    %101 = vector.broadcast %cst_52 : f32 to vector<16x1xf32>
    %102 = arith.mulf %100, %101 : vector<16x1xf32>
    %103 = vector.broadcast %102 : vector<16x1xf32> to vector<16x128xf32>
    %104 = arith.subf %98, %103 : vector<16x128xf32>
    %105 = arith.mulf %104, %104 : vector<16x128xf32>
    %cst_53 = arith.constant dense<0.000000e+00> : vector<16xf32>
    %106 = vector.multi_reduction <add>, %105, %cst_53 [1] : vector<16x128xf32> to vector<16xf32>
    %107 = vector.shape_cast %106 : vector<16xf32> to vector<16x1xf32>
    %cst_54 = arith.constant 7.812500e-03 : f32
    %108 = vector.broadcast %cst_54 : f32 to vector<16x1xf32>
    %109 = arith.mulf %107, %108 : vector<16x1xf32>
    %cst_55 = arith.constant 9.99999974E-6 : f32
    %110 = vector.broadcast %cst_55 : f32 to vector<16x1xf32>
    %111 = arith.addf %109, %110 : vector<16x1xf32>
    %112 = math.rsqrt %111 : vector<16x1xf32>
    %113 = vector.broadcast %112 : vector<16x1xf32> to vector<16x128xf32>
    %114 = arith.mulf %104, %113 : vector<16x128xf32>
    %cst_56 = arith.constant 0.000000e+00 : f32
    %115 = vector.broadcast %cst_56 : f32 to vector<16x128xf32>
    %116 = arith.maximumf %114, %115 : vector<16x128xf32>
    %c9_i32 = arith.constant 9 : i32
    %117 = tpu.dynamic_rotate %116 by %c9_i32 dim 1 : vector<16x128xf32>, i32 -> vector<16x128xf32>
    %c0_57 = arith.constant 0 : index
    %c0_58 = arith.constant 0 : index
    %118 = vector.load %arg8[%c0_57, %c0_58] : memref<9x128xf32, #tpu.memory_space<vmem>>, vector<1x128xf32>
    %119 = vector.broadcast %118 : vector<1x128xf32> to vector<16x128xf32>
    %120 = arith.mulf %117, %119 : vector<16x128xf32>
    %c8_i32 = arith.constant 8 : i32
    %121 = tpu.dynamic_rotate %116 by %c8_i32 dim 1 : vector<16x128xf32>, i32 -> vector<16x128xf32>
    %c1_59 = arith.constant 1 : index
    %c0_60 = arith.constant 0 : index
    %122 = vector.load %arg8[%c1_59, %c0_60] : memref<9x128xf32, #tpu.memory_space<vmem>>, vector<1x128xf32>
    %123 = vector.broadcast %122 : vector<1x128xf32> to vector<16x128xf32>
    %124 = arith.mulf %121, %123 : vector<16x128xf32>
    %c7_i32 = arith.constant 7 : i32
    %125 = tpu.dynamic_rotate %116 by %c7_i32 dim 1 : vector<16x128xf32>, i32 -> vector<16x128xf32>
    %c2_61 = arith.constant 2 : index
    %c0_62 = arith.constant 0 : index
    %126 = vector.load %arg8[%c2_61, %c0_62] : memref<9x128xf32, #tpu.memory_space<vmem>>, vector<1x128xf32>
    %127 = vector.broadcast %126 : vector<1x128xf32> to vector<16x128xf32>
    %128 = arith.mulf %125, %127 : vector<16x128xf32>
    %c1_i32_63 = arith.constant 1 : i32
    %129 = tpu.dynamic_rotate %116 by %c1_i32_63 dim 1 : vector<16x128xf32>, i32 -> vector<16x128xf32>
    %c3_64 = arith.constant 3 : index
    %c0_65 = arith.constant 0 : index
    %130 = vector.load %arg8[%c3_64, %c0_65] : memref<9x128xf32, #tpu.memory_space<vmem>>, vector<1x128xf32>
    %131 = vector.broadcast %130 : vector<1x128xf32> to vector<16x128xf32>
    %132 = arith.mulf %129, %131 : vector<16x128xf32>
    %c4_66 = arith.constant 4 : index
    %c0_67 = arith.constant 0 : index
    %133 = vector.load %arg8[%c4_66, %c0_67] : memref<9x128xf32, #tpu.memory_space<vmem>>, vector<1x128xf32>
    %134 = vector.broadcast %133 : vector<1x128xf32> to vector<16x128xf32>
    %135 = arith.mulf %116, %134 : vector<16x128xf32>
    %c127_i32 = arith.constant 127 : i32
    %136 = tpu.dynamic_rotate %116 by %c127_i32 dim 1 : vector<16x128xf32>, i32 -> vector<16x128xf32>
    %c5_68 = arith.constant 5 : index
    %c0_69 = arith.constant 0 : index
    %137 = vector.load %arg8[%c5_68, %c0_69] : memref<9x128xf32, #tpu.memory_space<vmem>>, vector<1x128xf32>
    %138 = vector.broadcast %137 : vector<1x128xf32> to vector<16x128xf32>
    %139 = arith.mulf %136, %138 : vector<16x128xf32>
    %c121_i32 = arith.constant 121 : i32
    %140 = tpu.dynamic_rotate %116 by %c121_i32 dim 1 : vector<16x128xf32>, i32 -> vector<16x128xf32>
    %c6_70 = arith.constant 6 : index
    %c0_71 = arith.constant 0 : index
    %141 = vector.load %arg8[%c6_70, %c0_71] : memref<9x128xf32, #tpu.memory_space<vmem>>, vector<1x128xf32>
    %142 = vector.broadcast %141 : vector<1x128xf32> to vector<16x128xf32>
    %143 = arith.mulf %140, %142 : vector<16x128xf32>
    %c120_i32 = arith.constant 120 : i32
    %144 = tpu.dynamic_rotate %116 by %c120_i32 dim 1 : vector<16x128xf32>, i32 -> vector<16x128xf32>
    %c7_72 = arith.constant 7 : index
    %c0_73 = arith.constant 0 : index
    %145 = vector.load %arg8[%c7_72, %c0_73] : memref<9x128xf32, #tpu.memory_space<vmem>>, vector<1x128xf32>
    %146 = vector.broadcast %145 : vector<1x128xf32> to vector<16x128xf32>
    %147 = arith.mulf %144, %146 : vector<16x128xf32>
    %c119_i32 = arith.constant 119 : i32
    %148 = tpu.dynamic_rotate %116 by %c119_i32 dim 1 : vector<16x128xf32>, i32 -> vector<16x128xf32>
    %c8_74 = arith.constant 8 : index
    %c0_75 = arith.constant 0 : index
    %149 = vector.load %arg8[%c8_74, %c0_75] : memref<9x128xf32, #tpu.memory_space<vmem>>, vector<1x128xf32>
    %150 = vector.broadcast %149 : vector<1x128xf32> to vector<16x128xf32>
    %151 = arith.mulf %148, %150 : vector<16x128xf32>
    %152 = tpu.concatenate %120, %124, %128, %132, %135, %139, %143, %147, %151 in 0 : vector<16x128xf32>, vector<16x128xf32>, vector<16x128xf32>, vector<16x128xf32>, vector<16x128xf32>, vector<16x128xf32>, vector<16x128xf32>, vector<16x128xf32>, vector<16x128xf32> -> vector<144x128xf32>
    %153 = arith.truncf %152 : vector<144x128xf32> to vector<144x128xbf16>
    %c0_76 = arith.constant 0 : index
    %c0_77 = arith.constant 0 : index
    %154 = vector.load %arg3[%c0_76, %c0_77] : memref<16x144xbf16, #tpu.memory_space<vmem>>, vector<16x144xbf16>
    %cst_78 = arith.constant dense<0.000000e+00> : vector<16x128xf32>
    %155 = tpu.matmul %154, %153, %cst_78 {dimension_numbers = #tpu.dot_dimension_numbers<[1], [0], [0], [1], [0, 0, 1, 1], [], []>} : vector<16x144xbf16>, vector<144x128xbf16>, vector<16x128xf32> -> vector<16x128xf32>
    %cst_79 = arith.constant dense<0.000000e+00> : vector<16xf32>
    %156 = vector.multi_reduction <add>, %155, %cst_79 [1] : vector<16x128xf32> to vector<16xf32>
    %157 = vector.shape_cast %156 : vector<16xf32> to vector<16x1xf32>
    %cst_80 = arith.constant 7.812500e-03 : f32
    %158 = vector.broadcast %cst_80 : f32 to vector<16x1xf32>
    %159 = arith.mulf %157, %158 : vector<16x1xf32>
    %160 = vector.broadcast %159 : vector<16x1xf32> to vector<16x128xf32>
    %161 = arith.subf %155, %160 : vector<16x128xf32>
    %162 = arith.mulf %161, %161 : vector<16x128xf32>
    %cst_81 = arith.constant dense<0.000000e+00> : vector<16xf32>
    %163 = vector.multi_reduction <add>, %162, %cst_81 [1] : vector<16x128xf32> to vector<16xf32>
    %164 = vector.shape_cast %163 : vector<16xf32> to vector<16x1xf32>
    %cst_82 = arith.constant 7.812500e-03 : f32
    %165 = vector.broadcast %cst_82 : f32 to vector<16x1xf32>
    %166 = arith.mulf %164, %165 : vector<16x1xf32>
    %cst_83 = arith.constant 9.99999974E-6 : f32
    %167 = vector.broadcast %cst_83 : f32 to vector<16x1xf32>
    %168 = arith.addf %166, %167 : vector<16x1xf32>
    %169 = math.rsqrt %168 : vector<16x1xf32>
    %170 = vector.broadcast %169 : vector<16x1xf32> to vector<16x128xf32>
    %171 = arith.mulf %161, %170 : vector<16x128xf32>
    %cst_84 = arith.constant 0.000000e+00 : f32
    %172 = vector.broadcast %cst_84 : f32 to vector<16x128xf32>
    %173 = arith.maximumf %171, %172 : vector<16x128xf32>
    %c9_i32_85 = arith.constant 9 : i32
    %174 = tpu.dynamic_rotate %173 by %c9_i32_85 dim 1 : vector<16x128xf32>, i32 -> vector<16x128xf32>
    %c0_86 = arith.constant 0 : index
    %c0_87 = arith.constant 0 : index
    %175 = vector.load %arg8[%c0_86, %c0_87] : memref<9x128xf32, #tpu.memory_space<vmem>>, vector<1x128xf32>
    %176 = vector.broadcast %175 : vector<1x128xf32> to vector<16x128xf32>
    %177 = arith.mulf %174, %176 : vector<16x128xf32>
    %c8_i32_88 = arith.constant 8 : i32
    %178 = tpu.dynamic_rotate %173 by %c8_i32_88 dim 1 : vector<16x128xf32>, i32 -> vector<16x128xf32>
    %c1_89 = arith.constant 1 : index
    %c0_90 = arith.constant 0 : index
    %179 = vector.load %arg8[%c1_89, %c0_90] : memref<9x128xf32, #tpu.memory_space<vmem>>, vector<1x128xf32>
    %180 = vector.broadcast %179 : vector<1x128xf32> to vector<16x128xf32>
    %181 = arith.mulf %178, %180 : vector<16x128xf32>
    %c7_i32_91 = arith.constant 7 : i32
    %182 = tpu.dynamic_rotate %173 by %c7_i32_91 dim 1 : vector<16x128xf32>, i32 -> vector<16x128xf32>
    %c2_92 = arith.constant 2 : index
    %c0_93 = arith.constant 0 : index
    %183 = vector.load %arg8[%c2_92, %c0_93] : memref<9x128xf32, #tpu.memory_space<vmem>>, vector<1x128xf32>
    %184 = vector.broadcast %183 : vector<1x128xf32> to vector<16x128xf32>
    %185 = arith.mulf %182, %184 : vector<16x128xf32>
    %c1_i32_94 = arith.constant 1 : i32
    %186 = tpu.dynamic_rotate %173 by %c1_i32_94 dim 1 : vector<16x128xf32>, i32 -> vector<16x128xf32>
    %c3_95 = arith.constant 3 : index
    %c0_96 = arith.constant 0 : index
    %187 = vector.load %arg8[%c3_95, %c0_96] : memref<9x128xf32, #tpu.memory_space<vmem>>, vector<1x128xf32>
    %188 = vector.broadcast %187 : vector<1x128xf32> to vector<16x128xf32>
    %189 = arith.mulf %186, %188 : vector<16x128xf32>
    %c4_97 = arith.constant 4 : index
    %c0_98 = arith.constant 0 : index
    %190 = vector.load %arg8[%c4_97, %c0_98] : memref<9x128xf32, #tpu.memory_space<vmem>>, vector<1x128xf32>
    %191 = vector.broadcast %190 : vector<1x128xf32> to vector<16x128xf32>
    %192 = arith.mulf %173, %191 : vector<16x128xf32>
    %c127_i32_99 = arith.constant 127 : i32
    %193 = tpu.dynamic_rotate %173 by %c127_i32_99 dim 1 : vector<16x128xf32>, i32 -> vector<16x128xf32>
    %c5_100 = arith.constant 5 : index
    %c0_101 = arith.constant 0 : index
    %194 = vector.load %arg8[%c5_100, %c0_101] : memref<9x128xf32, #tpu.memory_space<vmem>>, vector<1x128xf32>
    %195 = vector.broadcast %194 : vector<1x128xf32> to vector<16x128xf32>
    %196 = arith.mulf %193, %195 : vector<16x128xf32>
    %c121_i32_102 = arith.constant 121 : i32
    %197 = tpu.dynamic_rotate %173 by %c121_i32_102 dim 1 : vector<16x128xf32>, i32 -> vector<16x128xf32>
    %c6_103 = arith.constant 6 : index
    %c0_104 = arith.constant 0 : index
    %198 = vector.load %arg8[%c6_103, %c0_104] : memref<9x128xf32, #tpu.memory_space<vmem>>, vector<1x128xf32>
    %199 = vector.broadcast %198 : vector<1x128xf32> to vector<16x128xf32>
    %200 = arith.mulf %197, %199 : vector<16x128xf32>
    %c120_i32_105 = arith.constant 120 : i32
    %201 = tpu.dynamic_rotate %173 by %c120_i32_105 dim 1 : vector<16x128xf32>, i32 -> vector<16x128xf32>
    %c7_106 = arith.constant 7 : index
    %c0_107 = arith.constant 0 : index
    %202 = vector.load %arg8[%c7_106, %c0_107] : memref<9x128xf32, #tpu.memory_space<vmem>>, vector<1x128xf32>
    %203 = vector.broadcast %202 : vector<1x128xf32> to vector<16x128xf32>
    %204 = arith.mulf %201, %203 : vector<16x128xf32>
    %c119_i32_108 = arith.constant 119 : i32
    %205 = tpu.dynamic_rotate %173 by %c119_i32_108 dim 1 : vector<16x128xf32>, i32 -> vector<16x128xf32>
    %c8_109 = arith.constant 8 : index
    %c0_110 = arith.constant 0 : index
    %206 = vector.load %arg8[%c8_109, %c0_110] : memref<9x128xf32, #tpu.memory_space<vmem>>, vector<1x128xf32>
    %207 = vector.broadcast %206 : vector<1x128xf32> to vector<16x128xf32>
    %208 = arith.mulf %205, %207 : vector<16x128xf32>
    %209 = tpu.concatenate %177, %181, %185, %189, %192, %196, %200, %204, %208 in 0 : vector<16x128xf32>, vector<16x128xf32>, vector<16x128xf32>, vector<16x128xf32>, vector<16x128xf32>, vector<16x128xf32>, vector<16x128xf32>, vector<16x128xf32>, vector<16x128xf32> -> vector<144x128xf32>
    %210 = arith.truncf %209 : vector<144x128xf32> to vector<144x128xbf16>
    %c0_111 = arith.constant 0 : index
    %c0_112 = arith.constant 0 : index
    %211 = vector.load %arg4[%c0_111, %c0_112] : memref<32x144xbf16, #tpu.memory_space<vmem>>, vector<32x144xbf16>
    %cst_113 = arith.constant dense<0.000000e+00> : vector<32x128xf32>
    %212 = tpu.matmul %211, %210, %cst_113 {dimension_numbers = #tpu.dot_dimension_numbers<[1], [0], [0], [1], [0, 0, 1, 1], [], []>} : vector<32x144xbf16>, vector<144x128xbf16>, vector<32x128xf32> -> vector<32x128xf32>
    %c0_114 = arith.constant 0 : index
    %c0_115 = arith.constant 0 : index
    %213 = vector.load %arg11[%c0_114, %c0_115] : memref<128x128xf32, #tpu.memory_space<vmem>>, vector<128x128xf32>
    %cst_116 = arith.constant dense<0.000000e+00> : vector<32x128xf32>
    %214 = tpu.matmul %212, %213, %cst_116 {dimension_numbers = #tpu.dot_dimension_numbers<[1], [0], [0], [1], [0, 0, 1, 1], [], []>} : vector<32x128xf32>, vector<128x128xf32>, vector<32x128xf32> -> vector<32x128xf32>
    %cst_117 = arith.constant dense<0.000000e+00> : vector<32xf32>
    %215 = vector.multi_reduction <add>, %214, %cst_117 [1] : vector<32x128xf32> to vector<32xf32>
    %216 = vector.shape_cast %215 : vector<32xf32> to vector<32x1xf32>
    %cst_118 = arith.constant 3.125000e-02 : f32
    %217 = vector.broadcast %cst_118 : f32 to vector<32x1xf32>
    %218 = arith.mulf %216, %217 : vector<32x1xf32>
    %219 = vector.broadcast %218 : vector<32x1xf32> to vector<32x128xf32>
    %220 = arith.subf %214, %219 : vector<32x128xf32>
    %c4_119 = arith.constant 4 : index
    %c0_120 = arith.constant 0 : index
    %221 = vector.load %arg9[%c4_119, %c0_120] : memref<9x128xf32, #tpu.memory_space<vmem>>, vector<1x128xf32>
    %222 = vector.broadcast %221 : vector<1x128xf32> to vector<32x128xf32>
    %223 = arith.mulf %220, %222 : vector<32x128xf32>
    %224 = arith.mulf %223, %223 : vector<32x128xf32>
    %cst_121 = arith.constant dense<0.000000e+00> : vector<32xf32>
    %225 = vector.multi_reduction <add>, %224, %cst_121 [1] : vector<32x128xf32> to vector<32xf32>
    %226 = vector.shape_cast %225 : vector<32xf32> to vector<32x1xf32>
    %cst_122 = arith.constant 3.125000e-02 : f32
    %227 = vector.broadcast %cst_122 : f32 to vector<32x1xf32>
    %228 = arith.mulf %226, %227 : vector<32x1xf32>
    %cst_123 = arith.constant 9.99999974E-6 : f32
    %229 = vector.broadcast %cst_123 : f32 to vector<32x1xf32>
    %230 = arith.addf %228, %229 : vector<32x1xf32>
    %231 = math.rsqrt %230 : vector<32x1xf32>
    %232 = vector.broadcast %231 : vector<32x1xf32> to vector<32x128xf32>
    %233 = arith.mulf %223, %232 : vector<32x128xf32>
    %cst_124 = arith.constant 0.000000e+00 : f32
    %234 = vector.broadcast %cst_124 : f32 to vector<32x128xf32>
    %235 = arith.maximumf %233, %234 : vector<32x128xf32>
    %c5_i32 = arith.constant 5 : i32
    %236 = tpu.dynamic_rotate %235 by %c5_i32 dim 1 : vector<32x128xf32>, i32 -> vector<32x128xf32>
    %c0_125 = arith.constant 0 : index
    %c0_126 = arith.constant 0 : index
    %237 = vector.load %arg9[%c0_125, %c0_126] : memref<9x128xf32, #tpu.memory_space<vmem>>, vector<1x128xf32>
    %238 = vector.broadcast %237 : vector<1x128xf32> to vector<32x128xf32>
    %239 = arith.mulf %236, %238 : vector<32x128xf32>
    %c4_i32 = arith.constant 4 : i32
    %240 = tpu.dynamic_rotate %235 by %c4_i32 dim 1 : vector<32x128xf32>, i32 -> vector<32x128xf32>
    %c1_127 = arith.constant 1 : index
    %c0_128 = arith.constant 0 : index
    %241 = vector.load %arg9[%c1_127, %c0_128] : memref<9x128xf32, #tpu.memory_space<vmem>>, vector<1x128xf32>
    %242 = vector.broadcast %241 : vector<1x128xf32> to vector<32x128xf32>
    %243 = arith.mulf %240, %242 : vector<32x128xf32>
    %c3_i32 = arith.constant 3 : i32
    %244 = tpu.dynamic_rotate %235 by %c3_i32 dim 1 : vector<32x128xf32>, i32 -> vector<32x128xf32>
    %c2_129 = arith.constant 2 : index
    %c0_130 = arith.constant 0 : index
    %245 = vector.load %arg9[%c2_129, %c0_130] : memref<9x128xf32, #tpu.memory_space<vmem>>, vector<1x128xf32>
    %246 = vector.broadcast %245 : vector<1x128xf32> to vector<32x128xf32>
    %247 = arith.mulf %244, %246 : vector<32x128xf32>
    %c1_i32_131 = arith.constant 1 : i32
    %248 = tpu.dynamic_rotate %235 by %c1_i32_131 dim 1 : vector<32x128xf32>, i32 -> vector<32x128xf32>
    %c3_132 = arith.constant 3 : index
    %c0_133 = arith.constant 0 : index
    %249 = vector.load %arg9[%c3_132, %c0_133] : memref<9x128xf32, #tpu.memory_space<vmem>>, vector<1x128xf32>
    %250 = vector.broadcast %249 : vector<1x128xf32> to vector<32x128xf32>
    %251 = arith.mulf %248, %250 : vector<32x128xf32>
    %c4_134 = arith.constant 4 : index
    %c0_135 = arith.constant 0 : index
    %252 = vector.load %arg9[%c4_134, %c0_135] : memref<9x128xf32, #tpu.memory_space<vmem>>, vector<1x128xf32>
    %253 = vector.broadcast %252 : vector<1x128xf32> to vector<32x128xf32>
    %254 = arith.mulf %235, %253 : vector<32x128xf32>
    %c127_i32_136 = arith.constant 127 : i32
    %255 = tpu.dynamic_rotate %235 by %c127_i32_136 dim 1 : vector<32x128xf32>, i32 -> vector<32x128xf32>
    %c5_137 = arith.constant 5 : index
    %c0_138 = arith.constant 0 : index
    %256 = vector.load %arg9[%c5_137, %c0_138] : memref<9x128xf32, #tpu.memory_space<vmem>>, vector<1x128xf32>
    %257 = vector.broadcast %256 : vector<1x128xf32> to vector<32x128xf32>
    %258 = arith.mulf %255, %257 : vector<32x128xf32>
    %c125_i32 = arith.constant 125 : i32
    %259 = tpu.dynamic_rotate %235 by %c125_i32 dim 1 : vector<32x128xf32>, i32 -> vector<32x128xf32>
    %c6_139 = arith.constant 6 : index
    %c0_140 = arith.constant 0 : index
    %260 = vector.load %arg9[%c6_139, %c0_140] : memref<9x128xf32, #tpu.memory_space<vmem>>, vector<1x128xf32>
    %261 = vector.broadcast %260 : vector<1x128xf32> to vector<32x128xf32>
    %262 = arith.mulf %259, %261 : vector<32x128xf32>
    %c124_i32 = arith.constant 124 : i32
    %263 = tpu.dynamic_rotate %235 by %c124_i32 dim 1 : vector<32x128xf32>, i32 -> vector<32x128xf32>
    %c7_141 = arith.constant 7 : index
    %c0_142 = arith.constant 0 : index
    %264 = vector.load %arg9[%c7_141, %c0_142] : memref<9x128xf32, #tpu.memory_space<vmem>>, vector<1x128xf32>
    %265 = vector.broadcast %264 : vector<1x128xf32> to vector<32x128xf32>
    %266 = arith.mulf %263, %265 : vector<32x128xf32>
    %c123_i32 = arith.constant 123 : i32
    %267 = tpu.dynamic_rotate %235 by %c123_i32 dim 1 : vector<32x128xf32>, i32 -> vector<32x128xf32>
    %c8_143 = arith.constant 8 : index
    %c0_144 = arith.constant 0 : index
    %268 = vector.load %arg9[%c8_143, %c0_144] : memref<9x128xf32, #tpu.memory_space<vmem>>, vector<1x128xf32>
    %269 = vector.broadcast %268 : vector<1x128xf32> to vector<32x128xf32>
    %270 = arith.mulf %267, %269 : vector<32x128xf32>
    %271 = tpu.concatenate %239, %243, %247, %251, %254, %258, %262, %266, %270 in 0 : vector<32x128xf32>, vector<32x128xf32>, vector<32x128xf32>, vector<32x128xf32>, vector<32x128xf32>, vector<32x128xf32>, vector<32x128xf32>, vector<32x128xf32>, vector<32x128xf32> -> vector<288x128xf32>
    %272 = arith.truncf %271 : vector<288x128xf32> to vector<288x128xbf16>
    %c0_145 = arith.constant 0 : index
    %c0_146 = arith.constant 0 : index
    %273 = vector.load %arg5[%c0_145, %c0_146] : memref<32x288xbf16, #tpu.memory_space<vmem>>, vector<32x288xbf16>
    %cst_147 = arith.constant dense<0.000000e+00> : vector<32x128xf32>
    %274 = tpu.matmul %273, %272, %cst_147 {dimension_numbers = #tpu.dot_dimension_numbers<[1], [0], [0], [1], [0, 0, 1, 1], [], []>} : vector<32x288xbf16>, vector<288x128xbf16>, vector<32x128xf32> -> vector<32x128xf32>
    %cst_148 = arith.constant dense<0.000000e+00> : vector<32xf32>
    %275 = vector.multi_reduction <add>, %274, %cst_148 [1] : vector<32x128xf32> to vector<32xf32>
    %276 = vector.shape_cast %275 : vector<32xf32> to vector<32x1xf32>
    %cst_149 = arith.constant 3.125000e-02 : f32
    %277 = vector.broadcast %cst_149 : f32 to vector<32x1xf32>
    %278 = arith.mulf %276, %277 : vector<32x1xf32>
    %279 = vector.broadcast %278 : vector<32x1xf32> to vector<32x128xf32>
    %280 = arith.subf %274, %279 : vector<32x128xf32>
    %c4_150 = arith.constant 4 : index
    %c0_151 = arith.constant 0 : index
    %281 = vector.load %arg9[%c4_150, %c0_151] : memref<9x128xf32, #tpu.memory_space<vmem>>, vector<1x128xf32>
    %282 = vector.broadcast %281 : vector<1x128xf32> to vector<32x128xf32>
    %283 = arith.mulf %280, %282 : vector<32x128xf32>
    %284 = arith.mulf %283, %283 : vector<32x128xf32>
    %cst_152 = arith.constant dense<0.000000e+00> : vector<32xf32>
    %285 = vector.multi_reduction <add>, %284, %cst_152 [1] : vector<32x128xf32> to vector<32xf32>
    %286 = vector.shape_cast %285 : vector<32xf32> to vector<32x1xf32>
    %cst_153 = arith.constant 3.125000e-02 : f32
    %287 = vector.broadcast %cst_153 : f32 to vector<32x1xf32>
    %288 = arith.mulf %286, %287 : vector<32x1xf32>
    %cst_154 = arith.constant 9.99999974E-6 : f32
    %289 = vector.broadcast %cst_154 : f32 to vector<32x1xf32>
    %290 = arith.addf %288, %289 : vector<32x1xf32>
    %291 = math.rsqrt %290 : vector<32x1xf32>
    %292 = vector.broadcast %291 : vector<32x1xf32> to vector<32x128xf32>
    %293 = arith.mulf %283, %292 : vector<32x128xf32>
    %cst_155 = arith.constant 0.000000e+00 : f32
    %294 = vector.broadcast %cst_155 : f32 to vector<32x128xf32>
    %295 = arith.maximumf %293, %294 : vector<32x128xf32>
    %c5_i32_156 = arith.constant 5 : i32
    %296 = tpu.dynamic_rotate %295 by %c5_i32_156 dim 1 : vector<32x128xf32>, i32 -> vector<32x128xf32>
    %c0_157 = arith.constant 0 : index
    %c0_158 = arith.constant 0 : index
    %297 = vector.load %arg9[%c0_157, %c0_158] : memref<9x128xf32, #tpu.memory_space<vmem>>, vector<1x128xf32>
    %298 = vector.broadcast %297 : vector<1x128xf32> to vector<32x128xf32>
    %299 = arith.mulf %296, %298 : vector<32x128xf32>
    %c4_i32_159 = arith.constant 4 : i32
    %300 = tpu.dynamic_rotate %295 by %c4_i32_159 dim 1 : vector<32x128xf32>, i32 -> vector<32x128xf32>
    %c1_160 = arith.constant 1 : index
    %c0_161 = arith.constant 0 : index
    %301 = vector.load %arg9[%c1_160, %c0_161] : memref<9x128xf32, #tpu.memory_space<vmem>>, vector<1x128xf32>
    %302 = vector.broadcast %301 : vector<1x128xf32> to vector<32x128xf32>
    %303 = arith.mulf %300, %302 : vector<32x128xf32>
    %c3_i32_162 = arith.constant 3 : i32
    %304 = tpu.dynamic_rotate %295 by %c3_i32_162 dim 1 : vector<32x128xf32>, i32 -> vector<32x128xf32>
    %c2_163 = arith.constant 2 : index
    %c0_164 = arith.constant 0 : index
    %305 = vector.load %arg9[%c2_163, %c0_164] : memref<9x128xf32, #tpu.memory_space<vmem>>, vector<1x128xf32>
    %306 = vector.broadcast %305 : vector<1x128xf32> to vector<32x128xf32>
    %307 = arith.mulf %304, %306 : vector<32x128xf32>
    %c1_i32_165 = arith.constant 1 : i32
    %308 = tpu.dynamic_rotate %295 by %c1_i32_165 dim 1 : vector<32x128xf32>, i32 -> vector<32x128xf32>
    %c3_166 = arith.constant 3 : index
    %c0_167 = arith.constant 0 : index
    %309 = vector.load %arg9[%c3_166, %c0_167] : memref<9x128xf32, #tpu.memory_space<vmem>>, vector<1x128xf32>
    %310 = vector.broadcast %309 : vector<1x128xf32> to vector<32x128xf32>
    %311 = arith.mulf %308, %310 : vector<32x128xf32>
    %c4_168 = arith.constant 4 : index
    %c0_169 = arith.constant 0 : index
    %312 = vector.load %arg9[%c4_168, %c0_169] : memref<9x128xf32, #tpu.memory_space<vmem>>, vector<1x128xf32>
    %313 = vector.broadcast %312 : vector<1x128xf32> to vector<32x128xf32>
    %314 = arith.mulf %295, %313 : vector<32x128xf32>
    %c127_i32_170 = arith.constant 127 : i32
    %315 = tpu.dynamic_rotate %295 by %c127_i32_170 dim 1 : vector<32x128xf32>, i32 -> vector<32x128xf32>
    %c5_171 = arith.constant 5 : index
    %c0_172 = arith.constant 0 : index
    %316 = vector.load %arg9[%c5_171, %c0_172] : memref<9x128xf32, #tpu.memory_space<vmem>>, vector<1x128xf32>
    %317 = vector.broadcast %316 : vector<1x128xf32> to vector<32x128xf32>
    %318 = arith.mulf %315, %317 : vector<32x128xf32>
    %c125_i32_173 = arith.constant 125 : i32
    %319 = tpu.dynamic_rotate %295 by %c125_i32_173 dim 1 : vector<32x128xf32>, i32 -> vector<32x128xf32>
    %c6_174 = arith.constant 6 : index
    %c0_175 = arith.constant 0 : index
    %320 = vector.load %arg9[%c6_174, %c0_175] : memref<9x128xf32, #tpu.memory_space<vmem>>, vector<1x128xf32>
    %321 = vector.broadcast %320 : vector<1x128xf32> to vector<32x128xf32>
    %322 = arith.mulf %319, %321 : vector<32x128xf32>
    %c124_i32_176 = arith.constant 124 : i32
    %323 = tpu.dynamic_rotate %295 by %c124_i32_176 dim 1 : vector<32x128xf32>, i32 -> vector<32x128xf32>
    %c7_177 = arith.constant 7 : index
    %c0_178 = arith.constant 0 : index
    %324 = vector.load %arg9[%c7_177, %c0_178] : memref<9x128xf32, #tpu.memory_space<vmem>>, vector<1x128xf32>
    %325 = vector.broadcast %324 : vector<1x128xf32> to vector<32x128xf32>
    %326 = arith.mulf %323, %325 : vector<32x128xf32>
    %c123_i32_179 = arith.constant 123 : i32
    %327 = tpu.dynamic_rotate %295 by %c123_i32_179 dim 1 : vector<32x128xf32>, i32 -> vector<32x128xf32>
    %c8_180 = arith.constant 8 : index
    %c0_181 = arith.constant 0 : index
    %328 = vector.load %arg9[%c8_180, %c0_181] : memref<9x128xf32, #tpu.memory_space<vmem>>, vector<1x128xf32>
    %329 = vector.broadcast %328 : vector<1x128xf32> to vector<32x128xf32>
    %330 = arith.mulf %327, %329 : vector<32x128xf32>
    %331 = tpu.concatenate %299, %303, %307, %311, %314, %318, %322, %326, %330 in 0 : vector<32x128xf32>, vector<32x128xf32>, vector<32x128xf32>, vector<32x128xf32>, vector<32x128xf32>, vector<32x128xf32>, vector<32x128xf32>, vector<32x128xf32>, vector<32x128xf32> -> vector<288x128xf32>
    %332 = arith.truncf %331 : vector<288x128xf32> to vector<288x128xbf16>
    %c0_182 = arith.constant 0 : index
    %c0_183 = arith.constant 0 : index
    %333 = vector.load %arg6[%c0_182, %c0_183] : memref<8x288xbf16, #tpu.memory_space<vmem>>, vector<8x288xbf16>
    %cst_184 = arith.constant dense<0.000000e+00> : vector<8x128xf32>
    %334 = tpu.matmul %333, %332, %cst_184 {dimension_numbers = #tpu.dot_dimension_numbers<[1], [0], [0], [1], [0, 0, 1, 1], [], []>} : vector<8x288xbf16>, vector<288x128xbf16>, vector<8x128xf32> -> vector<8x128xf32>
    %c0_185 = arith.constant 0 : index
    %c0_186 = arith.constant 0 : index
    %335 = vector.load %arg12[%c0_185, %c0_186] : memref<8x128xf32, #tpu.memory_space<vmem>>, vector<8x128xf32>
    tpu.vector_store %arg12[%c0_185, %c0_186], %334 {strides = array<i32>} : memref<8x128xf32, #tpu.memory_space<vmem>>, vector<8x128xf32>,
    return
  }
}

</mosaic_0001>

<bundles_post_ra>
// kernel: weightnet_forward.1
= control target key start
LH: loop header
LB: loop body
LE: loop exit
PB: predicated region body
PF: predicated region fallthrough
CT: control target
= control target key end

     0   :  { %s2520_s23 = smov 16   ;;  %s2521_s24 = smov 17   ;;  %v2527_v4 = vmov 0   ;;  %v54_v5 = vlaneseq  ;;  %vm419_vm8 = vcmask 1043456   ;;  %vm415_vm9 = vcmask 588800   ;;  %s3779_s0 = inlined_call_operand.vmem [shape: f32[8,512], index: 0, kind: input, shape index: {}]   ;;  %s3780_s7 = inlined_call_operand.vmem [shape: f32[9,512], index: 7, kind: input, shape index: {}]   ;;  %s3781_s1 = inlined_call_operand.vmem [shape: bf16[8,72], index: 1, kind: input, shape index: {}]   ;;  %s3782_s2 = inlined_call_operand.vmem [shape: bf16[16,72], index: 2, kind: input, shape index: {}]   ;;  %s3783_s10 = inlined_call_operand.vmem [shape: f32[512,128], index: 10, kind: input, shape index: {}]   ;;  %s3784_s8 = inlined_call_operand.vmem [shape: f32[9,128], index: 8, kind: input, shape index: {}]   ;;  %s3785_s3 = inlined_call_operand.vmem [shape: bf16[16,144], index: 3, kind: input, shape index: {}]   ;;  %s3786_s4 = inlined_call_operand.vmem [shape: bf16[32,144], index: 4, kind: input, shape index: {}]   ;;  %s3787_s11 = inlined_call_operand.vmem [shape: f32[128,128], index: 11, kind: input, shape index: {}]   ;;  %s3788_s9 = inlined_call_operand.vmem [shape: f32[9,128], index: 9, kind: input, shape index: {}]   ;;  %s3789_s5 = inlined_call_operand.vmem [shape: bf16[32,288], index: 5, kind: input, shape index: {}]   ;;  %s3790_s6 = inlined_call_operand.vmem [shape: bf16[8,288], index: 6, kind: input, shape index: {}]   ;;  %s3791_s12 = inlined_call_operand.vmem [shape: f32[8,128], index: 12, kind: output, shape index: {}]  }
   0x1   :  { %v2611_v0 = vld [vmem:[%s3779_s0] sm:$0xff]  ;;  %v2620_v1 = vld [vmem:[%s3779_s0 + $0x8] sm:$0xff]  ;;  %v2629_v2 = vld [vmem:[%s3779_s0 + $0x18] sm:$0xff]  ;;  %s2522_s13 = smov 15   ;;  %s2523_s14 = smov 1   ;;  %464 = vmatprep.mubr.bf16.mxu0 %v2527_v4  ;;  %505 = vmatprep.mubr.bf16.mxu1 %v2527_v4  ;;  %vm1157_vm10 = vcmask 130048  }
   0x2   :  { %87 = vrot.lane.b32.xlu1 %v2611_v0, %s2520_s23  ;;  %46 = vrot.lane.b32.xlu0 %v2611_v0, %s2521_s24  ;;  %v2638_v3 = vld [vmem:[%s3779_s0 + $0x10] sm:$0xff]  ;;  %s2524_s0 = smov 127   ;;  %s2525_s15 = smov 113   ;;  %v64_v6 = vshrl.u32 %v54_v5, 7  ;;  %v2694_v7 = vand.u32 127, %v54_v5  ;;  %vm1716_vm11 = vcmask 261120  }
   0x3   :  { %s2526_s16 = smov 112   ;;  %s2528_s17 = smov 111   ;;  %v61_v9 = vld [vmem:[%s3780_s7] ss:$8 sm:$0xf]  ;;  %vm2542_vm12 = vmmov 0  }
   0x4   :  { %v2696_v8 = vsub.s32 1, %v64_v6  ;;  %v2091_v10 = vld [vmem:[%s3780_s7 + $0x1] ss:$8 sm:$0xf]  ;;  %vm95_vm0 = vcmp.lt.s32.totalorder %v2694_v7, 16  ;;  %vm56_vm1 = vcmp.lt.s32.totalorder %v2694_v7, 17 }
   0x5   :  { %v2712_v15 = vsub.s32 0, %v64_v6  ;;  %v2718_v20 = vsub.s32 3, %v64_v6  ;;  %v2720_v21 = vsub.s32 2, %v64_v6  ;;  %v2092_v48 = vld [vmem:[%s3780_s7 + $0x2] ss:$8 sm:$0xf] }
   0x6   :  { %89 = vrot.lane.b32.xlu1 %v2620_v1, %s2520_s23  ;;  %48 = vrot.lane.b32.xlu0 %v2620_v1, %s2521_s24  ;;  %v2707_v13 = vrot.slane %v61_v9, %v2696_v8  ;;  %v2710_v14 = vrot.slane %v2091_v10, %v2696_v8  ;;  %v2093_v49 = vld [vmem:[%s3780_s7 + $0x3] ss:$8 sm:$0xf]  ;;  %vm135_vm2 = vcmp.lt.s32.totalorder %v2694_v7, 15  ;;  %v2768_v54 = vrot.slane %v2092_v48, %v2696_v8  ;;  %s2531_s21 = smov 7   ;;  %s2532_s22 = smov 121  }
   0x7   :  { %v2725_v24 = vrot.slane %v61_v9, %v2712_v15  ;;  %v2728_v25 = vrot.slane %v2091_v10, %v2712_v15  ;;  %v2735_v31 = vrot.slane %v61_v9, %v2718_v20  ;;  %v2738_v32 = vrot.slane %v2091_v10, %v2718_v20  ;;  %s2533_s25 = smov 120   ;;  %s2534_s26 = smov 119  }
   0x8   :  { %v2743_v35 = vrot.slane %v61_v9, %v2720_v21  ;;  %v2746_v36 = vrot.slane %v2091_v10, %v2720_v21  ;;  %vm175_vm3 = vcmp.lt.s32.totalorder %v2694_v7, 1  ;;  %v2772_v55 = vrot.slane %v2093_v49, %v2696_v8  ;;  %v2094_v10 = vld [vmem:[%s3780_s7 + $0x4] ss:$8 sm:$0xf]  ;;  %s2535_s20 = smov 5   ;;  %s2537_s27 = smov 125  }
   0x9   :  { %v2781_v62 = vrot.slane %v2093_v49, %v2712_v15  ;;  %v2784_v63 = vrot.slane %v2092_v48, %v2712_v15  ;;  %vm242_vm4 = vcmp.lt.s32.totalorder %v2694_v7, 127  ;;  %vm282_vm5 = vcmp.lt.s32.totalorder %v2694_v7, 113 }
   0xa   :  { %93 = vrot.lane.b32.xlu1 %v2629_v2, %s2520_s23  ;;  %52 = vrot.lane.b32.xlu0 %v2629_v2, %s2521_s24  ;;  %vm322_vm6 = vcmp.lt.s32.totalorder %v2694_v7, 112  ;;  %vm362_vm7 = vcmp.lt.s32.totalorder %v2694_v7, 111  ;;  %v804_v7 = vld [vmem:[%s3783_s10] sm:$0xff] }
   0xe   :  { %91 = vrot.lane.b32.xlu1 %v2638_v3, %s2520_s23  ;;  %50 = vrot.lane.b32.xlu0 %v2638_v3, %s2521_s24 }
  0x12   :  { %129 = vrot.lane.b32.xlu1 %v2620_v1, %s2522_s13  ;;  %127 = vrot.lane.b32.xlu0 %v2611_v0, %s2522_s13 }
  0x16   :  { %169 = vrot.lane.b32.xlu1 %v2620_v1, %s2523_s14  ;;  %167 = vrot.lane.b32.xlu0 %v2611_v0, %s2523_s14 }
  0x1a   :  { %173 = vrot.lane.b32.xlu1 %v2629_v2, %s2523_s14  ;;  %133 = vrot.lane.b32.xlu0 %v2629_v2, %s2522_s13 }
  0x1e   :  { %171 = vrot.lane.b32.xlu1 %v2638_v3, %s2523_s14  ;;  %131 = vrot.lane.b32.xlu0 %v2638_v3, %s2522_s13 }
  0x22   :  { %238 = vrot.lane.b32.xlu1 %v2638_v3, %s2524_s0  ;;  %236 = vrot.lane.b32.xlu0 %v2620_v1, %s2524_s0 }
  0x26   :  { %240 = vrot.lane.b32.xlu1 %v2629_v2, %s2524_s0  ;;  %234 = vrot.lane.b32.xlu0 %v2611_v0, %s2524_s0 }
  0x2a   :  { %278 = vrot.lane.b32.xlu1 %v2638_v3, %s2525_s15  ;;  %276 = vrot.lane.b32.xlu0 %v2620_v1, %s2525_s15 }
  0x2e   :  { %318 = vrot.lane.b32.xlu1 %v2638_v3, %s2526_s16  ;;  %316 = vrot.lane.b32.xlu0 %v2620_v1, %s2526_s16 }
  0x32   :  { %314 = vrot.lane.b32.xlu1 %v2611_v0, %s2526_s16  ;;  %274 = vrot.lane.b32.xlu0 %v2611_v0, %s2525_s15 }
  0x36   :  { %320 = vrot.lane.b32.xlu1 %v2629_v2, %s2526_s16  ;;  %280 = vrot.lane.b32.xlu0 %v2629_v2, %s2525_s15 }
  0x3a   :  { %356 = vrot.lane.b32.xlu1 %v2620_v1, %s2528_s17  ;;  %354 = vrot.lane.b32.xlu0 %v2611_v0, %s2528_s17 }
  0x3e   :  { %360 = vrot.lane.b32.xlu1 %v2629_v2, %s2528_s17  ;;  %358 = vrot.lane.b32.xlu0 %v2638_v3, %s2528_s17 }
  0x74   :  { %v88_v11 = vpop.permute.xlu1 %87  ;;  %v47_v12 = vpop.permute.xlu0 %46 }
  0x78   :  { %v90_v16 = vpop.permute.xlu1 %89  ;;  %v49_v17 = vpop.permute.xlu0 %48 }
  0x79   :  { %v59_v18 = vsel %vm56_vm1, %v47_v12, %v49_v17  ;;  %v98_v19 = vsel %vm95_vm0, %v88_v11, %v90_v16 }
  0x7a   :  { %v84_v22 = vmul.f32 %v2707_v13, %v59_v18  ;;  %v124_v23 = vmul.f32 %v2710_v14, %v98_v19  ;;  %v2095_v18 = vld [vmem:[%s3780_s7 + $0x5] ss:$8 sm:$0xf] }
  0x7c   :  { %v94_v26 = vpop.permute.xlu1 %93  ;;  %v53_v27 = vpop.permute.xlu0 %52  ;;  %v395_v28 = vpack.c.bf16 %v124_v23, %v84_v22  ;;  %v2805_v23 = vrot.slane %v2092_v48, %v2720_v21 }
  0x7d   :  { %v99_v29 = vsel %vm95_vm0, %v94_v26, %v88_v11  ;;  %v60_v30 = vsel %vm56_vm1, %v53_v27, %v47_v12 }
  0x7e   :  { %432 = vmatprep.subr.bf16.mxu0 %v395_v28  ;;  %v83_v33 = vmul.f32 %v2725_v24, %v60_v30  ;;  %v123_v34 = vmul.f32 %v2728_v25, %v99_v29 }
  0x80   :  { %v92_v37 = vpop.permute.xlu1 %91  ;;  %v51_v38 = vpop.permute.xlu0 %50  ;;  %v394_v39 = vpack.c.bf16 %v123_v34, %v83_v33  ;;  %v2815_v33 = vrot.slane %v2095_v18, %v2696_v8 }
  0x81   :  { %v97_v40 = vsel %vm95_vm0, %v90_v16, %v92_v37  ;;  %v58_v41 = vsel %vm56_vm1, %v49_v17, %v51_v38  ;;  %v57_v42 = vsel %vm56_vm1, %v51_v38, %v53_v27  ;;  %v96_v43 = vsel %vm95_vm0, %v92_v37, %v94_v26 }
  0x82   :  { %433 = vmatpush1.bf16.msra.mxu0 %v394_v39  ;;  %v86_v44 = vmul.f32 %v2735_v31, %v57_v42  ;;  %v126_v45 = vmul.f32 %v2738_v32, %v96_v43  ;;  %v85_v46 = vmul.f32 %v2743_v35, %v58_v41  ;;  %v125_v47 = vmul.f32 %v2746_v36, %v97_v40 }
  0x83   :  { %v2794_v16 = vrot.slane %v2093_v49, %v2720_v21  ;;  %v2797_v17 = vrot.slane %v2093_v49, %v2718_v20  ;;  %v2808_v26 = vrot.slane %v2092_v48, %v2718_v20  ;;  %v2811_v27 = vrot.slane %v2094_v10, %v2696_v8 }
  0x84   :  { %v130_v50 = vpop.permute.xlu1 %129  ;;  %v128_v51 = vpop.permute.xlu0 %127  ;;  %v397_v52 = vpack.c.bf16 %v126_v45, %v86_v44  ;;  %v396_v53 = vpack.c.bf16 %v125_v47, %v85_v46  ;;  %v2832_v45 = vrot.slane %v2094_v10, %v2712_v15 }
  0x85   :  { %v138_v56 = vsel %vm135_vm2, %v128_v51, %v130_v50  ;;  %v231_v44 = vmul.f32 %v2811_v27, %v2620_v1  ;;  %v2844_v1 = vrot.slane %v2095_v18, %v2720_v21 }
  0x86   :  { %473 = vmatprep.subr.bf16.mxu1 %v397_v52  ;;  %v164_v60 = vmul.f32 %v2768_v54, %v138_v56  ;;  %v2847_v56 = vrot.slane %v2095_v18, %v2712_v15 }
  0x87   :  { %474 = vmatpush1.bf16.msra.mxu1 %v396_v53 }
  0x88   :  { %v170_v57 = vpop.permute.xlu1 %169  ;;  %v168_v58 = vpop.permute.xlu0 %167 }
  0x89   :  { %v178_v59 = vsel %vm175_vm3, %v168_v58, %v170_v57 }
  0x8a   :  { %v204_v61 = vmul.f32 %v2772_v55, %v178_v59 }
  0x8c   :  { %v174_v5 = vpop.permute.xlu1 %173  ;;  %v134_v6 = vpop.permute.xlu0 %133  ;;  %v399_v9 = vpack.c.bf16 %v204_v61, %v164_v60  ;;  %v230_v61 = vmul.f32 %v2832_v45, %v2611_v0 }
  0x8d   :  { %v179_v11 = vsel %vm175_vm3, %v174_v5, %v168_v58  ;;  %v139_v12 = vsel %vm135_vm2, %v134_v6, %v128_v51  ;;  %v2838_v51 = vrot.slane %v2094_v10, %v2720_v21 }
  0x8e   :  { %v203_v19 = vmul.f32 %v2781_v62, %v179_v11  ;;  %v163_v22 = vmul.f32 %v2784_v63, %v139_v12  ;;  %434 = vmatprep.subr.bf16.mxu0 %v399_v9 }
  0x90   :  { %v172_v28 = vpop.permute.xlu1 %171  ;;  %v132_v29 = vpop.permute.xlu0 %131  ;;  %v398_v30 = vpack.c.bf16 %v203_v19, %v163_v22 }
  0x91   :  { %v176_v34 = vsel %vm175_vm3, %v172_v28, %v174_v5  ;;  %v177_v37 = vsel %vm175_vm3, %v170_v57, %v172_v28  ;;  %v136_v38 = vsel %vm135_vm2, %v132_v29, %v134_v6  ;;  %v137_v39 = vsel %vm135_vm2, %v130_v50, %v132_v29 }
  0x92   :  { %v205_v40 = vmul.f32 %v2794_v16, %v177_v37  ;;  %v206_v41 = vmul.f32 %v2797_v17, %v176_v34  ;;  %v165_v42 = vmul.f32 %v2805_v23, %v137_v39  ;;  %v166_v43 = vmul.f32 %v2808_v26, %v136_v38  ;;  %435 = vmatpush1.bf16.msra.mxu0 %v398_v30 }
  0x93   :  { %v2835_v50 = vrot.slane %v2094_v10, %v2718_v20  ;;  %v2850_v57 = vrot.slane %v2095_v18, %v2718_v20  ;;  %v232_v6 = vmul.f32 %v2838_v51, %v2638_v3  ;;  %v2097_v3 = vld [vmem:[%s3780_s7 + $0x7] ss:$8 sm:$0xf] }
  0x94   :  { %v239_v46 = vpop.permute.xlu1 %238  ;;  %v237_v47 = vpop.permute.xlu0 %236  ;;  %v401_v48 = vpack.c.bf16 %v206_v41, %v166_v43  ;;  %v400_v49 = vpack.c.bf16 %v205_v40, %v165_v42  ;;  %v2879_v37 = vrot.slane %v2097_v3, %v2696_v8 }
  0x95   :  { %v244_v52 = vsel %vm242_vm4, %v237_v47, %v239_v46  ;;  %v233_v5 = vmul.f32 %v2835_v50, %v2629_v2  ;;  %v2096_v2 = vld [vmem:[%s3780_s7 + $0x6] ss:$8 sm:$0xf] }
  0x96   :  { %v271_v53 = vmul.f32 %v2815_v33, %v244_v52  ;;  %475 = vmatprep.subr.bf16.mxu1 %v401_v48  ;;  %v2875_v34 = vrot.slane %v2096_v2, %v2696_v8 }
  0x97   :  { %476 = vmatpush1.bf16.msra.mxu1 %v400_v49 }
  0x98   :  { %v241_v58 = vpop.permute.xlu1 %240  ;;  %v235_v59 = vpop.permute.xlu0 %234  ;;  %v403_v60 = vpack.c.bf16 %v271_v53, %v231_v44  ;;  %v2888_v44 = vrot.slane %v2097_v3, %v2712_v15 }
  0x99   :  { %v243_v9 = vsel %vm242_vm4, %v239_v46, %v241_v58  ;;  %v245_v10 = vsel %vm242_vm4, %v235_v59, %v237_v47  ;;  %v246_v11 = vsel %vm242_vm4, %v241_v58, %v235_v59  ;;  %v2891_v46 = vrot.slane %v2096_v2, %v2712_v15 }
  0x9a   :  { %v272_v12 = vmul.f32 %v2844_v1, %v243_v9  ;;  %v270_v18 = vmul.f32 %v2847_v56, %v245_v10  ;;  %v273_v0 = vmul.f32 %v2850_v57, %v246_v11  ;;  %436 = vmatprep.subr.bf16.mxu0 %v403_v60  ;;  %v2898_v58 = vrot.slane %v2097_v3, %v2720_v21  ;;  %v2098_v60 = vld [vmem:[%s3780_s7 + $0x20] ss:$8 sm:$0xf]  ;;  %s2536_s7 = smov 4  }
  0x9b   :  { %v2901_v59 = vrot.slane %v2097_v3, %v2718_v20  ;;  %v2912_v9 = vrot.slane %v2096_v2, %v2718_v20 }
  0x9c   :  { %v279_v19 = vpop.permute.xlu1 %278  ;;  %v277_v22 = vpop.permute.xlu0 %276  ;;  %v402_v28 = vpack.c.bf16 %v270_v18, %v230_v61  ;;  %v405_v29 = vpack.c.bf16 %v273_v0, %v233_v5  ;;  %v404_v30 = vpack.c.bf16 %v272_v12, %v232_v6  ;;  %v2909_v6 = vrot.slane %v2096_v2, %v2720_v21 }
  0x9d   :  { %v284_v38 = vsel %vm282_vm5, %v277_v22, %v279_v19  ;;  %v2916_v18 = vrot.slane %v2098_v60, %v2712_v15 }
  0x9e   :  { %437 = vmatpush1.bf16.msra.mxu0 %v402_v28  ;;  %477 = vmatprep.subr.bf16.mxu1 %v405_v29  ;;  %v311_v42 = vmul.f32 %v2875_v34, %v284_v38 }
  0x9f   :  { %478 = vmatpush1.bf16.msra.mxu1 %v404_v30 }
  0xa0   :  { %v319_v39 = vpop.permute.xlu1 %318  ;;  %v317_v40 = vpop.permute.xlu0 %316 }
  0xa1   :  { %v324_v41 = vsel %vm322_vm6, %v317_v40, %v319_v39 }
  0xa2   :  { %v351_v43 = vmul.f32 %v2879_v37, %v324_v41 }
  0xa4   :  { %v315_v47 = vpop.permute.xlu1 %314  ;;  %v275_v48 = vpop.permute.xlu0 %274  ;;  %v407_v49 = vpack.c.bf16 %v351_v43, %v311_v42  ;;  %v2936_v43 = vrot.slane %v2098_v60, %v2696_v8 }
  0xa5   :  { %v325_v52 = vsel %vm322_vm6, %v315_v47, %v317_v40  ;;  %v285_v53 = vsel %vm282_vm5, %v275_v48, %v277_v22 }
  0xa6   :  { %v350_v61 = vmul.f32 %v2888_v44, %v325_v52  ;;  %v310_v5 = vmul.f32 %v2891_v46, %v285_v53  ;;  %438 = vmatprep.subr.bf16.mxu0 %v407_v49 }
  0xa8   :  { %v321_v10 = vpop.permute.xlu1 %320  ;;  %v281_v11 = vpop.permute.xlu0 %280  ;;  %v406_v12 = vpack.c.bf16 %v350_v61, %v310_v5 }
  0xa9   :  { %v323_v0 = vsel %vm322_vm6, %v319_v39, %v321_v10  ;;  %v326_v3 = vsel %vm322_vm6, %v321_v10, %v315_v47  ;;  %v283_v22 = vsel %vm282_vm5, %v279_v19, %v281_v11  ;;  %v286_v2 = vsel %vm282_vm5, %v281_v11, %v275_v48 }
  0xaa   :  { %v352_v28 = vmul.f32 %v2898_v58, %v323_v0  ;;  %v353_v29 = vmul.f32 %v2901_v59, %v326_v3  ;;  %v312_v30 = vmul.f32 %v2909_v6, %v283_v22  ;;  %v313_v15 = vmul.f32 %v2912_v9, %v286_v2  ;;  %439 = vmatpush1.bf16.msra.mxu0 %v406_v12  ;;  %v414_v22 = vld [vmem:[%s3781_s1] sm:$0xf]  ;;  %s2538_s1 = smov 3  }
  0xab   :  { %v2933_v19 = vrot.slane %v2098_v60, %v2718_v20  ;;  %v2940_v48 = vrot.slane %v2098_v60, %v2720_v21 }
  0xac   :  { %v357_v38 = vpop.permute.xlu1 %356  ;;  %v355_v39 = vpop.permute.xlu0 %354  ;;  %v409_v40 = vpack.c.bf16 %v353_v29, %v313_v15  ;;  %v408_v41 = vpack.c.bf16 %v352_v28, %v312_v30 }
  0xad   :  { %v365_v42 = vsel %vm362_vm7, %v355_v39, %v357_v38 }
  0xae   :  { %479 = vmatprep.subr.bf16.mxu1 %v409_v40  ;;  %v390_v47 = vmul.f32 %v2916_v18, %v365_v42 }
  0xaf   :  { %480 = vmatpush1.bf16.msra.mxu1 %v408_v41 }
  0xb0   :  { %v361_v49 = vpop.permute.xlu1 %360  ;;  %v359_v52 = vpop.permute.xlu0 %358  ;;  %v410_v10 = vpack.c.bf16 %v390_v47, %v390_v47 }
  0xb1   :  { %v366_v53 = vsel %vm362_vm7, %v361_v49, %v355_v39  ;;  %v363_v61 = vsel %vm362_vm7, %v359_v52, %v361_v49  ;;  %v364_v20 = vsel %vm362_vm7, %v357_v38, %v359_v52 }
  0xb2   :  { %v393_v8 = vmul.f32 %v2933_v19, %v366_v53  ;;  %v391_v5 = vmul.f32 %v2936_v43, %v364_v20  ;;  %v392_v21 = vmul.f32 %v2940_v48, %v363_v61  ;;  %v421_v0 = vsel %vm419_vm8, %v410_v10, 0 }
  0xb4   :  { %v413_v60 = vpack.c.bf16 %v393_v8, %v393_v8  ;;  %v411_v11 = vpack.c.bf16 %v391_v5, %v391_v5  ;;  %v412_v12 = vpack.c.bf16 %v392_v21, %v392_v21 }
  0xb6   :  { %2099 = vmatprep.subr.msk.bf16.mxu0 %vm419_vm8, %v411_v11  ;;  %2101 = vmatprep.subr.msk.bf16.mxu1 %vm419_vm8, %v413_v60  ;;  %v427_v3 = vsel %vm419_vm8, %v412_v12, 0 }
  0xb7   :  { %441 = vmatpush1.bf16.msra.mxu0 %v421_v0  ;;  %482 = vmatpush1.bf16.msra.mxu1 %v427_v3 }
  0xba   :  { %2100 = vmatmul.mubr.msk.bf16.vlgmr.msra.gmra.mrb[0].mxu0 %vm415_vm9, %v414_v22  ;;  %2102 = vmatmul.mubr.msk.bf16.vlgmr.msra.gmra.mrb[0].mxu1 %vm415_vm9, %v414_v22 }
  0xbb   :  { %750 = vmatprep.mubr.bf16.mxu0 %v2527_v4  ;;  %793 = vmatprep.mubr.bf16.mxu1 %v2527_v4 }
 0x18d   :  { %v466_v2 = vpop.f32.mrb[0].mxu0  ;;  %v507_v28 = vpop.f32.mrb[0].mxu1 }
 0x18e   :  { %v468_v29 = vpop.f32.mrb[1].mxu0  ;;  %v509_v30 = vpop.f32.mrb[1].mxu1 }
 0x18f   :  { %v514_v15 = vadd.f32 %v468_v29, %v466_v2  ;;  %v470_v38 = vpop.f32.mrb[2].mxu0  ;;  %v511_v39 = vpop.f32.mrb[2].mxu1 }
 0x190   :  { %v471_v40 = vpop.f32.mrb[3].mxu0  ;;  %v512_v41 = vpop.f32.mrb[3].mxu1 }
 0x191   :  { %v515_v42 = vadd.f32 %v514_v15, %v507_v28 }
 0x193   :  { %v516_v47 = vadd.f32 %v515_v42, %v509_v30 }
 0x195   :  { %517 = vadd.xlane.f32.xlu0 %v516_v47 }
 0x222   :  { %v518_v49 = vpop.xlane.xlu0 %517 }
 0x223   :  { %v519_v52 = vmul.f32 0.001953125, %v518_v49 }
 0x225   :  { %v520_v53 = vsub.f32 %v466_v2, %v519_v52  ;;  %v521_v61 = vsub.f32 %v468_v29, %v519_v52  ;;  %v522_v20 = vsub.f32 %v507_v28, %v519_v52  ;;  %v523_v8 = vsub.f32 %v509_v30, %v519_v52 }
 0x227   :  { %v524_v5 = vmul.f32 %v520_v53, %v520_v53  ;;  %v525_v10 = vmul.f32 %v521_v61, %v521_v61  ;;  %v526_v21 = vmul.f32 %v522_v20, %v522_v20  ;;  %v527_v11 = vmul.f32 %v523_v8, %v523_v8 }
 0x229   :  { %v528_v60 = vadd.f32 %v525_v10, %v524_v5 }
 0x22b   :  { %v529_v12 = vadd.f32 %v528_v60, %v526_v21 }
 0x22d   :  { %v530_v0 = vadd.f32 %v529_v12, %v527_v11 }
 0x22f   :  { %531 = vadd.xlane.f32.xlu1 %v530_v0 }
 0x2bc   :  { %v532_v3 = vpop.xlane.xlu1 %531 }
 0x2bd   :  { %v533_v22 = vmul.f32 0.001953125, %v532_v3 }
 0x2bf   :  { %v534_v38 = vadd.f32 1e-05, %v533_v22 }
 0x2c1   :  { %2494 = vrsqrt.f32 %v534_v38 }
 0x2cb   :  { %v2495_v15 = vpop.eup %2494 }
 0x2cc   :  { %v537_v39 = vmul.f32 %v2495_v15, %v521_v61  ;;  %v536_v40 = vmul.f32 %v2495_v15, %v520_v53  ;;  %v539_v28 = vmul.f32 %v2495_v15, %v523_v8  ;;  %v538_v29 = vmul.f32 %v2495_v15, %v522_v20 }
 0x2ce   :  { %v2962_v41 = vmax.f32 %v537_v39, 0.0  ;;  %v2964_v2 = vmax.f32 %v536_v40, 0.0  ;;  %v2970_v30 = vmax.f32 %v539_v28, 0.0  ;;  %v2972_v42 = vmax.f32 %v538_v29, 0.0 }
 0x2d0   :  { %546 = vrot.lane.b32.xlu1 %v2962_v41, %s2521_s24  ;;  %544 = vrot.lane.b32.xlu0 %v2964_v2, %s2521_s24 }
 0x2d4   :  { %550 = vrot.lane.b32.xlu1 %v2970_v30, %s2521_s24  ;;  %548 = vrot.lane.b32.xlu0 %v2972_v42, %s2521_s24 }
 0x2d8   :  { %562 = vrot.lane.b32.xlu1 %v2962_v41, %s2520_s23  ;;  %560 = vrot.lane.b32.xlu0 %v2964_v2, %s2520_s23 }
 0x2dc   :  { %566 = vrot.lane.b32.xlu1 %v2970_v30, %s2520_s23  ;;  %564 = vrot.lane.b32.xlu0 %v2972_v42, %s2520_s23  ;;  %s2539_s23 = smov 124  }
 0x2e0   :  { %578 = vrot.lane.b32.xlu1 %v2962_v41, %s2522_s13  ;;  %576 = vrot.lane.b32.xlu0 %v2964_v2, %s2522_s13 }
 0x2e4   :  { %582 = vrot.lane.b32.xlu1 %v2970_v30, %s2522_s13  ;;  %580 = vrot.lane.b32.xlu0 %v2972_v42, %s2522_s13 }
 0x2e8   :  { %594 = vrot.lane.b32.xlu1 %v2962_v41, %s2523_s14  ;;  %592 = vrot.lane.b32.xlu0 %v2964_v2, %s2523_s14 }
 0x2ec   :  { %598 = vrot.lane.b32.xlu1 %v2970_v30, %s2523_s14  ;;  %596 = vrot.lane.b32.xlu0 %v2972_v42, %s2523_s14 }
 0x2f0   :  { %614 = vrot.lane.b32.xlu1 %v2962_v41, %s2524_s0  ;;  %612 = vrot.lane.b32.xlu0 %v2964_v2, %s2524_s0 }
 0x2f4   :  { %618 = vrot.lane.b32.xlu1 %v2970_v30, %s2524_s0  ;;  %616 = vrot.lane.b32.xlu0 %v2972_v42, %s2524_s0 }
 0x2f8   :  { %630 = vrot.lane.b32.xlu1 %v2962_v41, %s2525_s15  ;;  %628 = vrot.lane.b32.xlu0 %v2964_v2, %s2525_s15 }
 0x2fc   :  { %634 = vrot.lane.b32.xlu1 %v2970_v30, %s2525_s15  ;;  %632 = vrot.lane.b32.xlu0 %v2972_v42, %s2525_s15 }
 0x300   :  { %646 = vrot.lane.b32.xlu1 %v2962_v41, %s2526_s16  ;;  %644 = vrot.lane.b32.xlu0 %v2964_v2, %s2526_s16 }
 0x304   :  { %650 = vrot.lane.b32.xlu1 %v2970_v30, %s2526_s16  ;;  %648 = vrot.lane.b32.xlu0 %v2972_v42, %s2526_s16 }
 0x308   :  { %662 = vrot.lane.b32.xlu1 %v2962_v41, %s2528_s17  ;;  %660 = vrot.lane.b32.xlu0 %v2964_v2, %s2528_s17 }
 0x30c   :  { %666 = vrot.lane.b32.xlu1 %v2970_v30, %s2528_s17  ;;  %664 = vrot.lane.b32.xlu0 %v2972_v42, %s2528_s17 }
 0x342   :  { %v547_v47 = vpop.permute.xlu1 %546  ;;  %v545_v49 = vpop.permute.xlu0 %544 }
 0x343   :  { %v554_v61 = vsel %vm56_vm1, %v545_v49, %v547_v47 }
 0x344   :  { %v557_v21 = vmul.f32 %v554_v61, %v2707_v13 }
 0x346   :  { %v551_v52 = vpop.permute.xlu1 %550  ;;  %v549_v53 = vpop.permute.xlu0 %548 }
 0x347   :  { %v555_v5 = vsel %vm56_vm1, %v551_v52, %v545_v49  ;;  %v553_v60 = vsel %vm56_vm1, %v547_v47, %v549_v53  ;;  %v552_v12 = vsel %vm56_vm1, %v549_v53, %v551_v52 }
 0x348   :  { %v556_v0 = vmul.f32 %v555_v5, %v2725_v24  ;;  %v558_v15 = vmul.f32 %v553_v60, %v2743_v35 }
 0x34a   :  { %v563_v20 = vpop.permute.xlu1 %562  ;;  %v561_v8 = vpop.permute.xlu0 %560 }
 0x34b   :  { %v570_v10 = vsel %vm95_vm0, %v561_v8, %v563_v20 }
 0x34c   :  { %v573_v11 = vmul.f32 %v570_v10, %v2710_v14  ;;  %v559_v14 = vmul.f32 %v552_v12, %v2735_v31 }
 0x34e   :  { %v567_v3 = vpop.permute.xlu1 %566  ;;  %v565_v22 = vpop.permute.xlu0 %564  ;;  %v677_v38 = vpack.c.bf16 %v573_v11, %v557_v21 }
 0x34f   :  { %v571_v39 = vsel %vm95_vm0, %v567_v3, %v561_v8  ;;  %v568_v13 = vsel %vm95_vm0, %v565_v22, %v567_v3  ;;  %v569_v40 = vsel %vm95_vm0, %v563_v20, %v565_v22 }
 0x350   :  { %v572_v28 = vmul.f32 %v571_v39, %v2728_v25  ;;  %v574_v24 = vmul.f32 %v569_v40, %v2746_v36  ;;  %v575_v29 = vmul.f32 %v568_v13, %v2738_v32  ;;  %718 = vmatprep.subr.bf16.mxu0 %v677_v38 }
 0x352   :  { %v676_v47 = vpack.c.bf16 %v572_v28, %v556_v0  ;;  %v678_v35 = vpack.c.bf16 %v574_v24, %v558_v15  ;;  %v579_v49 = vpop.permute.xlu1 %578  ;;  %v577_v52 = vpop.permute.xlu0 %576  ;;  %v679_v53 = vpack.c.bf16 %v575_v29, %v559_v14 }
 0x353   :  { %v586_v31 = vsel %vm135_vm2, %v577_v52, %v579_v49 }
 0x354   :  { %719 = vmatpush1.bf16.msra.mxu0 %v676_v47  ;;  %761 = vmatprep.subr.bf16.mxu1 %v679_v53  ;;  %v589_v5 = vmul.f32 %v586_v31, %v2768_v54 }
 0x355   :  { %762 = vmatpush1.bf16.msra.mxu1 %v678_v35 }
 0x356   :  { %v583_v61 = vpop.permute.xlu1 %582  ;;  %v581_v8 = vpop.permute.xlu0 %580 }
 0x357   :  { %v587_v36 = vsel %vm135_vm2, %v583_v61, %v577_v52  ;;  %v585_v10 = vsel %vm135_vm2, %v579_v49, %v581_v8  ;;  %v584_v60 = vsel %vm135_vm2, %v581_v8, %v583_v61 }
 0x358   :  { %v588_v11 = vmul.f32 %v587_v36, %v2784_v63  ;;  %v590_v22 = vmul.f32 %v585_v10, %v2805_v23 }
 0x35a   :  { %v595_v20 = vpop.permute.xlu1 %594  ;;  %v593_v25 = vpop.permute.xlu0 %592 }
 0x35b   :  { %v602_v32 = vsel %vm175_vm3, %v593_v25, %v595_v20 }
 0x35c   :  { %v605_v21 = vmul.f32 %v602_v32, %v2772_v55  ;;  %v591_v55 = vmul.f32 %v584_v60, %v2808_v26 }
 0x35e   :  { %v599_v12 = vpop.permute.xlu1 %598  ;;  %v597_v0 = vpop.permute.xlu0 %596  ;;  %v681_v3 = vpack.c.bf16 %v605_v21, %v589_v5 }
 0x35f   :  { %v603_v38 = vsel %vm175_vm3, %v599_v12, %v593_v25  ;;  %v600_v54 = vsel %vm175_vm3, %v597_v0, %v599_v12  ;;  %v601_v15 = vsel %vm175_vm3, %v595_v20, %v597_v0 }
 0x360   :  { %v604_v39 = vmul.f32 %v603_v38, %v2781_v62  ;;  %v606_v63 = vmul.f32 %v601_v15, %v2794_v16  ;;  %v607_v13 = vmul.f32 %v600_v54, %v2797_v17  ;;  %720 = vmatprep.subr.bf16.mxu0 %v681_v3  ;;  %v610_v62 = vmul.f32 %v2972_v42, %v2838_v51 }
 0x361   :  { %v609_v16 = vmul.f32 %v2962_v41, %v2811_v27  ;;  %v611_v27 = vmul.f32 %v2970_v30, %v2835_v50 }
 0x362   :  { %v680_v40 = vpack.c.bf16 %v604_v39, %v588_v11  ;;  %v682_v23 = vpack.c.bf16 %v606_v63, %v590_v22  ;;  %v615_v14 = vpop.permute.xlu1 %614  ;;  %v613_v28 = vpop.permute.xlu0 %612  ;;  %v683_v24 = vpack.c.bf16 %v607_v13, %v591_v55 }
 0x363   :  { %v622_v29 = vsel %vm242_vm4, %v613_v28, %v615_v14 }
 0x364   :  { %721 = vmatpush1.bf16.msra.mxu0 %v680_v40  ;;  %763 = vmatprep.subr.bf16.mxu1 %v683_v24  ;;  %v624_v17 = vmul.f32 %v622_v29, %v2847_v56  ;;  %v608_v56 = vmul.f32 %v2964_v2, %v2832_v45  ;;  %v853_v24 = vld [vmem:[%s3783_s10 + $0x188] sm:$0xff] }
 0x365   :  { %764 = vmatpush1.bf16.msra.mxu1 %v682_v23 }
 0x366   :  { %v619_v47 = vpop.permute.xlu1 %618  ;;  %v617_v26 = vpop.permute.xlu0 %616  ;;  %v684_v25 = vpack.c.bf16 %v624_v17, %v608_v56  ;;  %v805_v17 = vld [vmem:[%s3783_s10 + $0x8] sm:$0xff] }
 0x367   :  { %v623_v35 = vsel %vm242_vm4, %v619_v47, %v613_v28  ;;  %v620_v49 = vsel %vm242_vm4, %v617_v26, %v619_v47  ;;  %v621_v52 = vsel %vm242_vm4, %v615_v14, %v617_v26  ;;  %v852_v28 = vld [vmem:[%s3783_s10 + $0x180] sm:$0xff] }
 0x368   :  { %v627_v53 = vmul.f32 %v623_v35, %v2850_v57  ;;  %v625_v61 = vmul.f32 %v621_v52, %v2815_v33  ;;  %v626_v51 = vmul.f32 %v620_v49, %v2844_v1 }
 0x36a   :  { %v686_v41 = vpack.c.bf16 %v626_v51, %v610_v62  ;;  %v631_v42 = vpop.permute.xlu1 %630  ;;  %v629_v8 = vpop.permute.xlu0 %628  ;;  %v685_v31 = vpack.c.bf16 %v625_v61, %v609_v16  ;;  %v687_v20 = vpack.c.bf16 %v627_v53, %v611_v27  ;;  %v2386_v53 = vpack.c.bf16 %v853_v24, %v852_v28  ;;  %v823_v61 = vld [vmem:[%s3783_s10 + $0x98] sm:$0xff]  ;;  %v854_v51 = vld [vmem:[%s3783_s10 + $0x190] sm:$0xff]  ;;  %v844_v24 = vld [vmem:[%s3783_s10 + $0x140] sm:$0xff] }
 0x36b   :  { %v638_v32 = vsel %vm282_vm5, %v629_v8, %v631_v42  ;;  %v855_v27 = vld [vmem:[%s3783_s10 + $0x198] sm:$0xff] }
 0x36c   :  { %722 = vmatprep.subr.bf16.mxu0 %v685_v31  ;;  %765 = vmatprep.subr.bf16.mxu1 %v687_v20  ;;  %v640_v54 = vmul.f32 %v638_v32, %v2891_v46  ;;  %v820_v46 = vld [vmem:[%s3783_s10 + $0x80] sm:$0xff]  ;;  %v806_v20 = vld [vmem:[%s3783_s10 + $0x10] sm:$0xff] }
 0x36d   :  { %723 = vmatpush1.bf16.msra.mxu0 %v684_v25  ;;  %766 = vmatpush1.bf16.msra.mxu1 %v686_v41  ;;  %v807_v25 = vld [vmem:[%s3783_s10 + $0x18] sm:$0xff] }
 0x36e   :  { %v635_v57 = vpop.permute.xlu1 %634  ;;  %v633_v33 = vpop.permute.xlu0 %632  ;;  %v2360_v32 = vpack.c.bf16 %v807_v25, %v806_v20  ;;  %v848_v25 = vld [vmem:[%s3783_s10 + $0x160] sm:$0xff] }
 0x36f   :  { %v639_v50 = vsel %vm282_vm5, %v635_v57, %v629_v8  ;;  %v637_v45 = vsel %vm282_vm5, %v631_v42, %v633_v33  ;;  %v636_v30 = vsel %vm282_vm5, %v633_v33, %v635_v57  ;;  %v2473_v42 = vld [vmem:[%s3782_s2] sm:$0xff]   ;;  %v2356_v8 = vpack.c.bf16 %v805_v17, %v804_v7  ;;  %s2530_s2 = smov 8  }
 0x370   :  { %v643_v5 = vmul.f32 %v639_v50, %v2912_v9  ;;  %v641_v10 = vmul.f32 %v637_v45, %v2875_v34  ;;  %v642_v22 = vmul.f32 %v636_v30, %v2909_v6  ;;  %v2390_v33 = vpack.c.bf16 %v855_v27, %v854_v51  ;;  %v824_v50 = vld [vmem:[%s3783_s10 + $0xa0] sm:$0xff]  ;;  %v825_v45 = vld [vmem:[%s3783_s10 + $0xa8] sm:$0xff] }
 0x371   :  { %v857_v30 = vld [vmem:[%s3783_s10 + $0x1a8] sm:$0xff]  ;;  %v864_v51 = vld [vmem:[%s3783_s10 + $0x1e0] sm:$0xff] }
 0x372   :  { %v647_v36 = vpop.permute.xlu1 %646  ;;  %v645_v1 = vpop.permute.xlu0 %644  ;;  %v865_v27 = vld [vmem:[%s3783_s10 + $0x1e8] sm:$0xff] }
 0x373   :  { %v654_v2 = vsel %vm322_vm6, %v645_v1, %v647_v36  ;;  %v2410_v20 = vpack.c.bf16 %v865_v27, %v864_v51 }
 0x374   :  { %v656_v11 = vmul.f32 %v654_v2, %v2888_v44  ;;  %v856_v2 = vld [vmem:[%s3783_s10 + $0x1a0] sm:$0xff] }
 0x376   :  { %v651_v21 = vpop.permute.xlu1 %650  ;;  %v649_v60 = vpop.permute.xlu0 %648  ;;  %v688_v13 = vpack.c.bf16 %v656_v11, %v640_v54  ;;  %v2394_v11 = vpack.c.bf16 %v857_v30, %v856_v2 }
 0x377   :  { %v655_v12 = vsel %vm322_vm6, %v651_v21, %v645_v1  ;;  %v652_v0 = vsel %vm322_vm6, %v649_v60, %v651_v21  ;;  %v653_v3 = vsel %vm322_vm6, %v647_v36, %v649_v60  ;;  %v838_v36 = vld [vmem:[%s3783_s10 + $0x110] sm:$0xff]  ;;  %v839_v1 = vld [vmem:[%s3783_s10 + $0x118] sm:$0xff]  ;;  %v809_v21 = vld [vmem:[%s3783_s10 + $0x28] sm:$0xff]  ;;  %v2362_v60 = vpack.c.bf16 %v825_v45, %v824_v50 }
 0x378   :  { %v659_v38 = vmul.f32 %v655_v12, %v2901_v59  ;;  %v657_v9 = vmul.f32 %v653_v3, %v2879_v37  ;;  %v658_v34 = vmul.f32 %v652_v0, %v2898_v58  ;;  %v821_v58 = vld [vmem:[%s3783_s10 + $0x88] sm:$0xff]  ;;  %v840_v12 = vld [vmem:[%s3783_s10 + $0x120] sm:$0xff]  ;;  %v826_v3 = vld [vmem:[%s3783_s10 + $0xb0] sm:$0xff] }
 0x379   :  { %v2354_v16 = vpack.c.bf16 %v821_v58, %v820_v46  ;;  %v841_v0 = vld [vmem:[%s3783_s10 + $0x128] sm:$0xff]  ;;  %v867_v50 = vld [vmem:[%s3783_s10 + $0x1f8] sm:$0xff] }
 0x37a   :  { %v690_v44 = vpack.c.bf16 %v658_v34, %v642_v22  ;;  %v663_v15 = vpop.permute.xlu1 %662  ;;  %v661_v55 = vpop.permute.xlu0 %660  ;;  %v689_v39 = vpack.c.bf16 %v657_v9, %v641_v10  ;;  %v691_v63 = vpack.c.bf16 %v659_v38, %v643_v5  ;;  %v2392_v5 = vpack.c.bf16 %v839_v1, %v838_v36  ;;  %v808_v10 = vld [vmem:[%s3783_s10 + $0x20] sm:$0xff]  ;;  %v827_v22 = vld [vmem:[%s3783_s10 + $0xb8] sm:$0xff]  ;;  %v858_v38 = vld [vmem:[%s3783_s10 + $0x1b0] sm:$0xff] }
 0x37b   :  { %v670_v40 = vsel %vm362_vm7, %v661_v55, %v663_v15  ;;  %v859_v9 = vld [vmem:[%s3783_s10 + $0x1b8] sm:$0xff]  ;;  %v2364_v34 = vpack.c.bf16 %v809_v21, %v808_v10  ;;  %v2396_v54 = vpack.c.bf16 %v841_v0, %v840_v12  ;;  %v866_v1 = vld [vmem:[%s3783_s10 + $0x1f0] sm:$0xff] }
 0x37c   :  { %v672_v23 = vmul.f32 %v670_v40, %v2916_v18  ;;  %724 = vmatprep.subr.bf16.mxu0 %v689_v39  ;;  %767 = vmatprep.subr.bf16.mxu1 %v691_v63  ;;  %v2398_v39 = vpack.c.bf16 %v859_v9, %v858_v38  ;;  %v842_v63 = vld [vmem:[%s3783_s10 + $0x130] sm:$0xff]  ;;  %v828_v40 = vld [vmem:[%s3783_s10 + $0xc0] sm:$0xff]  ;;  %v835_v36 = vld [vmem:[%s3783_s10 + $0xf8] sm:$0xff] }
 0x37d   :  { %725 = vmatpush1.bf16.msra.mxu0 %v688_v13  ;;  %768 = vmatpush1.bf16.msra.mxu1 %v690_v44  ;;  %v810_v44 = vld [vmem:[%s3783_s10 + $0x30] sm:$0xff]  ;;  %v843_v13 = vld [vmem:[%s3783_s10 + $0x138] sm:$0xff] }
 0x37e   :  { %v667_v37 = vpop.permute.xlu1 %666  ;;  %v665_v59 = vpop.permute.xlu0 %664  ;;  %v692_v29 = vpack.c.bf16 %v672_v23, %v672_v23  ;;  %v829_v23 = vld [vmem:[%s3783_s10 + $0xc8] sm:$0xff]  ;;  %v2400_v58 = vpack.c.bf16 %v843_v13, %v842_v63  ;;  %v819_v10 = vld [vmem:[%s3783_s10 + $0x78] sm:$0xff]  ;;  %v850_v21 = vld [vmem:[%s3783_s10 + $0x170] sm:$0xff] }
 0x37f   :  { %v671_v6 = vsel %vm362_vm7, %v667_v37, %v661_v55  ;;  %v668_v18 = vsel %vm362_vm7, %v665_v59, %v667_v37  ;;  %v669_v14 = vsel %vm362_vm7, %v663_v15, %v665_v59  ;;  %v811_v15 = vld [vmem:[%s3783_s10 + $0x38] sm:$0xff]  ;;  %v2366_v55 = vpack.c.bf16 %v827_v22, %v826_v3  ;;  %v860_v37 = vld [vmem:[%s3783_s10 + $0x1c0] sm:$0xff]  ;;  %v861_v59 = vld [vmem:[%s3783_s10 + $0x1c8] sm:$0xff] }
 0x380   :  { %v675_v47 = vmul.f32 %v671_v6, %v2933_v19  ;;  %v673_v62 = vmul.f32 %v669_v14, %v2936_v43  ;;  %v674_v26 = vmul.f32 %v668_v18, %v2940_v48  ;;  %v836_v19 = vld [vmem:[%s3783_s10 + $0x100] sm:$0xff]  ;;  %v837_v43 = vld [vmem:[%s3783_s10 + $0x108] sm:$0xff]  ;;  %v822_v48 = vld [vmem:[%s3783_s10 + $0x90] sm:$0xff]  ;;  %v707_v56 = vsel %vm419_vm8, %v692_v29, 0 }
 0x381   :  { %v2388_v31 = vpack.c.bf16 %v837_v43, %v836_v19  ;;  %v2358_v57 = vpack.c.bf16 %v823_v61, %v822_v48  ;;  %v2368_v46 = vpack.c.bf16 %v811_v15, %v810_v44  ;;  %v812_v6 = vld [vmem:[%s3783_s10 + $0x40] sm:$0xff]  ;;  %v813_v18 = vld [vmem:[%s3783_s10 + $0x48] sm:$0xff]  ;;  %v2370_v14 = vpack.c.bf16 %v829_v23, %v828_v40  ;;  %v846_v19 = vld [vmem:[%s3783_s10 + $0x150] sm:$0xff] }
 0x382   :  { %v695_v35 = vpack.c.bf16 %v675_v47, %v675_v47  ;;  %v693_v49 = vpack.c.bf16 %v673_v62, %v673_v62  ;;  %v694_v52 = vpack.c.bf16 %v674_v26, %v674_v26  ;;  %v2402_v28 = vpack.c.bf16 %v861_v59, %v860_v37  ;;  %v845_v29 = vld [vmem:[%s3783_s10 + $0x148] sm:$0xff]  ;;  %v830_v47 = vld [vmem:[%s3783_s10 + $0xd0] sm:$0xff]  ;;  %v831_v62 = vld [vmem:[%s3783_s10 + $0xd8] sm:$0xff] }
 0x383   :  { %v862_v26 = vld [vmem:[%s3783_s10 + $0x1d0] sm:$0xff]  ;;  %v2372_v7 = vpack.c.bf16 %v813_v18, %v812_v6  ;;  %v2404_v17 = vpack.c.bf16 %v845_v29, %v844_v24  ;;  %v847_v43 = vld [vmem:[%s3783_s10 + $0x158] sm:$0xff]  ;;  %v832_v48 = vld [vmem:[%s3783_s10 + $0xe0] sm:$0xff] }
 0x384   :  { %2104 = vmatprep.subr.msk.bf16.mxu0 %vm419_vm8, %v693_v49  ;;  %2106 = vmatprep.subr.msk.bf16.mxu1 %vm419_vm8, %v695_v35  ;;  %v713_v41 = vsel %vm419_vm8, %v694_v52, 0  ;;  %v814_v35 = vld [vmem:[%s3783_s10 + $0x50] sm:$0xff]  ;;  %v815_v49 = vld [vmem:[%s3783_s10 + $0x58] sm:$0xff]  ;;  %v2374_v52 = vpack.c.bf16 %v831_v62, %v830_v47  ;;  %v833_v61 = vld [vmem:[%s3783_s10 + $0xe8] sm:$0xff] }
 0x385   :  { %727 = vmatpush1.bf16.msra.mxu0 %v707_v56  ;;  %770 = vmatpush1.bf16.msra.mxu1 %v713_v41  ;;  %v2376_v56 = vpack.c.bf16 %v815_v49, %v814_v35  ;;  %v2408_v41 = vpack.c.bf16 %v847_v43, %v846_v19 }
 0x386   :  { %2355 = vmatprep.subr.bf16.mxu0 %v2354_v16  ;;  %2387 = vmatprep.subr.bf16.mxu1 %v2386_v53  ;;  %v863_v16 = vld [vmem:[%s3783_s10 + $0x1d8] sm:$0xff] }
 0x387   :  { %v2406_v53 = vpack.c.bf16 %v863_v16, %v862_v26 }
 0x388   :  { %2105 = vmatmul.mubr.msk.bf16.vlgmr.msra.gmra.mrb[4].mxu0 %vm415_vm9, %v2473_v42  ;;  %2107 = vmatmul.mubr.msk.bf16.vlgmr.msra.gmra.mrb[4].mxu1 %vm415_vm9, %v2473_v42  ;;  %v816_v42 = vld [vmem:[%s3783_s10 + $0x60] sm:$0xff] }
 0x389   :  { %2357 = vmatpush3.bf16.msra.mxu0 %v2356_v8  ;;  %2389 = vmatpush3.bf16.msra.mxu1 %v2388_v31  ;;  %v817_v8 = vld [vmem:[%s3783_s10 + $0x68] sm:$0xff]  ;;  %v2378_v31 = vpack.c.bf16 %v833_v61, %v832_v48 }
 0x38a   :  { %2359 = vmatprep.subr.bf16.mxu0 %v2358_v57  ;;  %2391 = vmatprep.subr.bf16.mxu1 %v2390_v33  ;;  %v849_v57 = vld [vmem:[%s3783_s10 + $0x168] sm:$0xff]  ;;  %v834_v33 = vld [vmem:[%s3783_s10 + $0xf0] sm:$0xff]  ;;  %v2380_v45 = vpack.c.bf16 %v817_v8, %v816_v42 }
 0x38b   :  { %v2412_v2 = vpack.c.bf16 %v849_v57, %v848_v25  ;;  %v2382_v30 = vpack.c.bf16 %v835_v36, %v834_v33  ;;  %v3374_v57 = vld [vmem:[%s3784_s8] ss:$0 sm:$0xff] }
 0x38d   :  { %2361 = vmatpush3.bf16.msra.mxu0 %v2360_v32  ;;  %2393 = vmatpush3.bf16.msra.mxu1 %v2392_v5  ;;  %v2414_v32 = vpack.c.bf16 %v867_v50, %v866_v1  ;;  %v818_v5 = vld [vmem:[%s3783_s10 + $0x70] sm:$0xff] }
 0x38e   :  { %2363 = vmatprep.subr.bf16.mxu0 %v2362_v60  ;;  %2395 = vmatprep.subr.bf16.mxu1 %v2394_v11  ;;  %v2384_v60 = vpack.c.bf16 %v819_v10, %v818_v5  ;;  %v851_v11 = vld [vmem:[%s3783_s10 + $0x178] sm:$0xff]  ;;  %s2529_s10 = smov 9  }
 0x38f   :  { %v2416_v12 = vpack.c.bf16 %v851_v11, %v850_v21  ;;  %v3388_v21 = vld [vmem:[%s3784_s8 + $0x2] ss:$0 sm:$0xff] }
 0x391   :  { %2365 = vmatpush3.bf16.msra.mxu0 %v2364_v34  ;;  %2397 = vmatpush3.bf16.msra.mxu1 %v2396_v54 }
 0x392   :  { %2367 = vmatprep.subr.bf16.mxu0 %v2366_v55  ;;  %2399 = vmatprep.subr.bf16.mxu1 %v2398_v39 }
 0x395   :  { %2369 = vmatpush3.bf16.msra.mxu0 %v2368_v46  ;;  %2401 = vmatpush3.bf16.msra.mxu1 %v2400_v58 }
 0x396   :  { %2371 = vmatprep.subr.bf16.mxu0 %v2370_v14  ;;  %2403 = vmatprep.subr.bf16.mxu1 %v2402_v28 }
 0x399   :  { %2373 = vmatpush3.bf16.msra.mxu0 %v2372_v7  ;;  %2405 = vmatpush3.bf16.msra.mxu1 %v2404_v17 }
 0x39a   :  { %2375 = vmatprep.subr.bf16.mxu0 %v2374_v52  ;;  %2407 = vmatprep.subr.bf16.mxu1 %v2406_v53 }
 0x39d   :  { %2377 = vmatpush3.bf16.msra.mxu0 %v2376_v56  ;;  %2409 = vmatpush3.bf16.msra.mxu1 %v2408_v41  ;;  %v3345_v56 = vld [vmem:[%s3784_s8 + $0x4] ss:$0 sm:$0xff] }
 0x39e   :  { %2379 = vmatprep.subr.bf16.mxu0 %v2378_v31  ;;  %2411 = vmatprep.subr.bf16.mxu1 %v2410_v20  ;;  %v2476_v20 = vld [vmem:[%s3785_s3 + $0x4] ss:$8 sps:$4 sm:$0xff]  }
 0x3a1   :  { %2381 = vmatpush3.bf16.msra.mxu0 %v2380_v45  ;;  %2413 = vmatpush3.bf16.msra.mxu1 %v2412_v2  ;;  %v3381_v45 = vld [vmem:[%s3784_s8 + $0x1] ss:$0 sm:$0xff] }
 0x3a2   :  { %2383 = vmatprep.subr.bf16.mxu0 %v2382_v30  ;;  %2415 = vmatprep.subr.bf16.mxu1 %v2414_v32 }
 0x3a5   :  { %2385 = vmatpush3.bf16.msra.mxu0 %v2384_v60  ;;  %2417 = vmatpush3.bf16.msra.mxu1 %v2416_v12 }
 0x3a6   :  { %1161 = vmatprep.subr.bf16.mxu0 %v2527_v4  ;;  %1313 = vmatprep.subr.bf16.mxu1 %v2527_v4 }
 0x45b   :  { %v752_v0 = vpop.f32.mrb[4].mxu0  ;;  %v795_v3 = vpop.f32.mrb[4].mxu1 }
 0x45c   :  { %v754_v22 = vpop.f32.mrb[5].mxu0  ;;  %v797_v38 = vpop.f32.mrb[5].mxu1 }
 0x45d   :  { %v756_v9 = vpop.f32.mrb[6].mxu0  ;;  %v799_v34 = vpop.f32.mrb[6].mxu1  ;;  %932 = vmatprep.mubr.f32.mxu0 %v754_v22  ;;  %1007 = vmatprep.mubr.f32.mxu1 %v797_v38  ;;  %v3396_v22 = vld [vmem:[%s3784_s8 + $0x3] ss:$0 sm:$0xff] }
 0x45e   :  { %v758_v54 = vpop.f32.mrb[7].mxu0  ;;  %v801_v44 = vpop.f32.mrb[7].mxu1  ;;  %933 = vmatmul.mubr.f32.vlgmr.msra.gmra.mrb[8].mxu0 %v752_v0  ;;  %1008 = vmatmul.mubr.f32.vlgmr.msra.gmra.mrb[8].mxu1 %v795_v3 }
 0x45f   :  { %937 = vmatprep.mubr.f32.mxu0 %v758_v54  ;;  %1012 = vmatprep.mubr.f32.mxu1 %v801_v44 }
 0x462   :  { %938 = vmatmul.mubr.f32.gmra.mrb[10].mxu0 %v756_v9  ;;  %1013 = vmatmul.mubr.f32.gmra.mrb[10].mxu1 %v799_v34 }
 0x463   :  { %2119 = vmatprep.mubr.msk.bf16.mxu0 %vm1157_vm10, %v2476_v20 }
 0x531   :  { %v2179_v15 = vpop.f32.mrb[8].mxu0  ;;  %v2217_v55 = vpop.f32.mrb[8].mxu1 }
 0x532   :  { %v2180_v39 = vpop.f32.mrb[9].mxu0  ;;  %v2218_v63 = vpop.f32.mrb[9].mxu1 }
 0x533   :  { %v2181_v13 = vadd.f32 %v2180_v39, %v2179_v15  ;;  %v2219_v40 = vadd.f32 %v2218_v63, %v2217_v55  ;;  %v3405_v39 = vld [vmem:[%s3784_s8 + $0x5] ss:$0 sm:$0xff] }
 0x535   :  { %v2182_v23 = vpop.f32.mrb[10].mxu0  ;;  %v2220_v37 = vpop.f32.mrb[10].mxu1  ;;  %v1010_v59 = vadd.f32 %v2219_v40, %v2181_v13 }
 0x536   :  { %v2183_v46 = vpop.f32.mrb[11].mxu0  ;;  %v2221_v58 = vpop.f32.mrb[11].mxu1 }
 0x537   :  { %v2184_v6 = vadd.f32 %v2183_v46, %v2182_v23  ;;  %v2222_v18 = vadd.f32 %v2221_v58, %v2220_v37  ;;  %1018 = vadd.xlane.f32.xlu0 %v1010_v59  ;;  %v3413_v37 = vld [vmem:[%s3784_s8 + $0x6] ss:$0 sm:$0xff] }
 0x539   :  { %v1015_v14 = vadd.f32 %v2222_v18, %v2184_v6 }
 0x53b   :  { %1020 = vadd.xlane.f32.xlu1 %v1015_v14 }
 0x5c4   :  { %v1019_v28 = vpop.xlane.xlu0 %1018 }
 0x5c5   :  { %v1022_v24 = vmul.f32 0.0078125, %v1019_v28 }
 0x5c7   :  { %v1024_v29 = vsub.f32 %v1010_v59, %v1022_v24 }
 0x5c8   :  { %v1021_v47 = vpop.xlane.xlu1 %1020 }
 0x5c9   :  { %v1023_v62 = vmul.f32 0.0078125, %v1021_v47  ;;  %v1026_v26 = vmul.f32 %v1024_v29, %v1024_v29 }
 0x5cb   :  { %1028 = vadd.xlane.f32.xlu0 %v1026_v26  ;;  %v1025_v16 = vsub.f32 %v1015_v14, %v1023_v62  ;;  %v3421_v14 = vld [vmem:[%s3784_s8 + $0x7] ss:$0 sm:$0xff]  ;;  %v3429_v62 = vld [vmem:[%s3784_s8 + $0x8] ss:$0 sm:$0xff]  ;;  %s2540_s8 = smov 123  }
 0x5cd   :  { %v1027_v7 = vmul.f32 %v1025_v16, %v1025_v16 }
 0x5cf   :  { %1030 = vadd.xlane.f32.xlu0 %v1027_v7 }
 0x658   :  { %v1029_v17 = vpop.xlane.xlu0 %1028 }
 0x659   :  { %v1032_v35 = vmul.f32 0.0078125, %v1029_v17 }
 0x65b   :  { %v1034_v49 = vadd.f32 1e-05, %v1032_v35 }
 0x65c   :  { %v1031_v52 = vpop.xlane.xlu0 %1030 }
 0x65d   :  { %2496 = vrsqrt.f32 %v1034_v49  ;;  %v1033_v53 = vmul.f32 0.0078125, %v1031_v52  ;;  %v2474_v49 = vld [vmem:[%s3785_s3] ss:$8 sps:$4 sm:$0xff]  }
 0x65f   :  { %v1035_v19 = vadd.f32 1e-05, %v1033_v53 }
 0x661   :  { %2498 = vrsqrt.f32 %v1035_v19 }
 0x667   :  { %v2497_v43 = vpop.eup %2496 }
 0x668   :  { %v1038_v48 = vmul.f32 %v2497_v43, %v1024_v29 }
 0x66a   :  { %v1040_v61 = vmax.f32 %v1038_v48, 0.0 }
 0x66b   :  { %v2499_v51 = vpop.eup %2498 }
 0x66c   :  { %v1039_v27 = vmul.f32 %v2499_v51, %v1025_v16  ;;  %1042 = vrot.lane.b32.xlu1 %v1040_v61, %s2529_s10  ;;  %v3350_v42 = vmul.f32 %v3345_v56, %v1040_v61 }
 0x66e   :  { %v1041_v41 = vmax.f32 %v1039_v27, 0.0 }
 0x670   :  { %1053 = vrot.lane.b32.xlu1 %v1040_v61, %s2530_s2  ;;  %1044 = vrot.lane.b32.xlu0 %v1041_v41, %s2529_s10  ;;  %v1092_v8 = vmul.f32 %v3345_v56, %v1041_v41 }
 0x672   :  { %v1141_v31 = vpack.c.bf16 %v1092_v8, %v3350_v42 }
 0x674   :  { %1055 = vrot.lane.b32.xlu1 %v1041_v41, %s2530_s2  ;;  %1064 = vrot.lane.b32.xlu0 %v1040_v61, %s2531_s21 }
 0x678   :  { %1066 = vrot.lane.b32.xlu1 %v1041_v41, %s2531_s21  ;;  %1075 = vrot.lane.b32.xlu0 %v1040_v61, %s2523_s14 }
 0x67c   :  { %1077 = vrot.lane.b32.xlu1 %v1041_v41, %s2523_s14  ;;  %1093 = vrot.lane.b32.xlu0 %v1040_v61, %s2524_s0 }
 0x680   :  { %1095 = vrot.lane.b32.xlu1 %v1041_v41, %s2524_s0  ;;  %1104 = vrot.lane.b32.xlu0 %v1040_v61, %s2532_s22 }
 0x684   :  { %1106 = vrot.lane.b32.xlu1 %v1041_v41, %s2532_s22  ;;  %1115 = vrot.lane.b32.xlu0 %v1040_v61, %s2533_s25 }
 0x688   :  { %1117 = vrot.lane.b32.xlu1 %v1041_v41, %s2533_s25  ;;  %1126 = vrot.lane.b32.xlu0 %v1040_v61, %s2534_s26 }
 0x68c   :  { %1128 = vrot.lane.b32.xlu1 %v1041_v41, %s2534_s26 }
 0x6de   :  { %v1043_v25 = vpop.permute.xlu1 %1042 }
 0x6df   :  { %v1051_v1 = vmul.f32 %v3374_v57, %v1043_v25 }
 0x6e2   :  { %v1054_v33 = vpop.permute.xlu1 %1053  ;;  %v1045_v36 = vpop.permute.xlu0 %1044 }
 0x6e3   :  { %v1052_v50 = vmul.f32 %v3374_v57, %v1045_v36  ;;  %v1062_v5 = vmul.f32 %v3381_v45, %v1054_v33 }
 0x6e5   :  { %v1137_v2 = vpack.c.bf16 %v1052_v50, %v1051_v1 }
 0x6e6   :  { %v1056_v30 = vpop.permute.xlu1 %1055  ;;  %v1065_v32 = vpop.permute.xlu0 %1064 }
 0x6e7   :  { %v1063_v10 = vmul.f32 %v3381_v45, %v1056_v30  ;;  %1162 = vmatpush1.bf16.msra.mxu0 %v1137_v2  ;;  %v1073_v0 = vmul.f32 %v3388_v21, %v1065_v32 }
 0x6e8   :  { %1163 = vmatprep.subr.bf16.mxu0 %v2527_v4 }
 0x6e9   :  { %v1138_v60 = vpack.c.bf16 %v1063_v10, %v1062_v5 }
 0x6ea   :  { %v1067_v11 = vpop.permute.xlu1 %1066  ;;  %v1076_v12 = vpop.permute.xlu0 %1075 }
 0x6eb   :  { %v1074_v3 = vmul.f32 %v3388_v21, %v1067_v11  ;;  %1164 = vmatpush1.bf16.msra.mxu0 %v1138_v60  ;;  %v1084_v54 = vmul.f32 %v3396_v22, %v1076_v12 }
 0x6ec   :  { %1165 = vmatprep.subr.bf16.mxu0 %v2527_v4 }
 0x6ed   :  { %v1139_v38 = vpack.c.bf16 %v1074_v3, %v1073_v0  ;;  %v1362_v3 = vld [vmem:[%s3787_s11] sm:$0xff] }
 0x6ee   :  { %v1078_v9 = vpop.permute.xlu1 %1077  ;;  %v1094_v34 = vpop.permute.xlu0 %1093 }
 0x6ef   :  { %v1085_v44 = vmul.f32 %v3396_v22, %v1078_v9  ;;  %1166 = vmatpush1.bf16.msra.mxu0 %v1139_v38  ;;  %v1102_v23 = vmul.f32 %v3405_v39, %v1094_v34  ;;  %v1363_v38 = vld [vmem:[%s3787_s11 + $0x8] sm:$0xff]  ;;  %v1364_v9 = vld [vmem:[%s3787_s11 + $0x10] sm:$0xff] }
 0x6f0   :  { %1167 = vmatprep.subr.bf16.mxu0 %v2527_v4  ;;  %v2418_v34 = vpack.c.bf16 %v1363_v38, %v1362_v3 }
 0x6f1   :  { %v1140_v15 = vpack.c.bf16 %v1085_v44, %v1084_v54  ;;  %v1365_v54 = vld [vmem:[%s3787_s11 + $0x18] sm:$0xff] }
 0x6f2   :  { %v1096_v55 = vpop.permute.xlu1 %1095  ;;  %v1105_v63 = vpop.permute.xlu0 %1104  ;;  %v2422_v44 = vpack.c.bf16 %v1365_v54, %v1364_v9 }
 0x6f3   :  { %1168 = vmatpush1.bf16.msra.mxu0 %v1140_v15  ;;  %v1103_v13 = vmul.f32 %v3405_v39, %v1096_v55  ;;  %v1113_v18 = vmul.f32 %v3413_v37, %v1105_v63  ;;  %v1366_v15 = vld [vmem:[%s3787_s11 + $0x20] sm:$0xff]  ;;  %v1367_v55 = vld [vmem:[%s3787_s11 + $0x28] sm:$0xff] }
 0x6f4   :  { %1169 = vmatprep.subr.bf16.mxu0 %v2527_v4  ;;  %v2426_v63 = vpack.c.bf16 %v1367_v55, %v1366_v15 }
 0x6f5   :  { %v1142_v59 = vpack.c.bf16 %v1103_v13, %v1102_v23  ;;  %v1368_v13 = vld [vmem:[%s3787_s11 + $0x30] sm:$0xff] }
 0x6f6   :  { %v1107_v40 = vpop.permute.xlu1 %1106  ;;  %v1116_v58 = vpop.permute.xlu0 %1115 }
 0x6f7   :  { %1170 = vmatpush1.bf16.msra.mxu0 %v1141_v31  ;;  %v1114_v46 = vmul.f32 %v3413_v37, %v1107_v40  ;;  %v1124_v47 = vmul.f32 %v3421_v14, %v1116_v58  ;;  %v1369_v40 = vld [vmem:[%s3787_s11 + $0x38] sm:$0xff] }
 0x6f8   :  { %1171 = vmatprep.subr.bf16.mxu0 %v2527_v4  ;;  %v2430_v23 = vpack.c.bf16 %v1369_v40, %v1368_v13 }
 0x6f9   :  { %v1143_v28 = vpack.c.bf16 %v1114_v46, %v1113_v18  ;;  %v1371_v46 = vld [vmem:[%s3787_s11 + $0x48] sm:$0xff]  ;;  %v1373_v18 = vld [vmem:[%s3787_s11 + $0x58] sm:$0xff] }
 0x6fa   :  { %v1118_v6 = vpop.permute.xlu1 %1117  ;;  %v1127_v26 = vpop.permute.xlu0 %1126 }
 0x6fb   :  { %1172 = vmatpush1.bf16.msra.mxu0 %v1142_v59  ;;  %v1125_v24 = vmul.f32 %v3421_v14, %v1118_v6  ;;  %v1135_v17 = vmul.f32 %v3429_v62, %v1127_v26  ;;  %v1370_v59 = vld [vmem:[%s3787_s11 + $0x40] sm:$0xff]  ;;  %v1372_v6 = vld [vmem:[%s3787_s11 + $0x50] sm:$0xff] }
 0x6fc   :  { %1173 = vmatprep.subr.bf16.mxu0 %v2527_v4  ;;  %v2434_v58 = vpack.c.bf16 %v1371_v46, %v1370_v59  ;;  %v1376_v26 = vld [vmem:[%s3787_s11 + $0x70] sm:$0xff] }
 0x6fd   :  { %v1144_v16 = vpack.c.bf16 %v1125_v24, %v1124_v47  ;;  %v1374_v24 = vld [vmem:[%s3787_s11 + $0x60] sm:$0xff] }
 0x6fe   :  { %v1129_v29 = vpop.permute.xlu1 %1128 }
 0x6ff   :  { %1174 = vmatpush1.bf16.msra.mxu0 %v1143_v28  ;;  %v1136_v7 = vmul.f32 %v3429_v62, %v1129_v29  ;;  %v2438_v28 = vpack.c.bf16 %v1373_v18, %v1372_v6  ;;  %v1375_v29 = vld [vmem:[%s3787_s11 + $0x68] sm:$0xff] }
 0x700   :  { %1175 = vmatprep.subr.bf16.mxu0 %v2527_v4  ;;  %v2442_v47 = vpack.c.bf16 %v1375_v29, %v1374_v24  ;;  %v3554_v24 = vld [vmem:[%s3788_s9 + $0x4] ss:$0 sm:$0xff] }
 0x701   :  { %v1145_v35 = vpack.c.bf16 %v1136_v7, %v1135_v17 }
 0x703   :  { %1176 = vmatpush1.bf16.msra.mxu0 %v1144_v16  ;;  %v1377_v16 = vld [vmem:[%s3787_s11 + $0x78] sm:$0xff] }
 0x704   :  { %1177 = vmatprep.subr.bf16.mxu0 %v2527_v4  ;;  %v2446_v7 = vpack.c.bf16 %v1377_v16, %v1376_v26 }
 0x707   :  { %1178 = vmatpush1.bf16.msra.mxu0 %v1145_v35 }
 0x708   :  { %2419 = vmatprep.subr.bf16.mxu0 %v2418_v34 }
 0x70a   :  { %1194 = vmatmul.mubr.bf16.vlgmr.msra.gmra.mrb[12].mxu0 %v2474_v49 }
 0x70b   :  { %2421 = vmatpush3.bf16.msra.mxu0 %v2418_v34  ;;  %v2477_v34 = vld [vmem:[%s3786_s4] ss:$8 sps:$4 sm:$0xff]  }
 0x70c   :  { %2423 = vmatprep.subr.bf16.mxu0 %v2422_v44 }
 0x70f   :  { %2425 = vmatpush3.bf16.msra.mxu0 %v2422_v44 }
 0x710   :  { %2427 = vmatprep.subr.bf16.mxu0 %v2426_v63 }
 0x713   :  { %2429 = vmatpush3.bf16.msra.mxu0 %v2426_v63 }
 0x714   :  { %2431 = vmatprep.subr.bf16.mxu0 %v2430_v23 }
 0x717   :  { %2433 = vmatpush3.bf16.msra.mxu0 %v2430_v23 }
 0x718   :  { %2435 = vmatprep.subr.bf16.mxu0 %v2434_v58 }
 0x71b   :  { %2437 = vmatpush3.bf16.msra.mxu0 %v2434_v58 }
 0x71c   :  { %2439 = vmatprep.subr.bf16.mxu0 %v2438_v28 }
 0x71f   :  { %2441 = vmatpush3.bf16.msra.mxu0 %v2438_v28 }
 0x720   :  { %2443 = vmatprep.subr.bf16.mxu0 %v2442_v47 }
 0x723   :  { %2445 = vmatpush3.bf16.msra.mxu0 %v2442_v47 }
 0x724   :  { %2447 = vmatprep.subr.bf16.mxu0 %v2446_v7 }
 0x727   :  { %2449 = vmatpush3.bf16.msra.mxu0 %v2446_v7 }
 0x7dd   :  { %v1195_v52 = vpop.f32.mrb[12].mxu0 }
 0x7de   :  { %1202 = vadd.xlane.f32.xlu0 %v1195_v52  ;;  %v1197_v53 = vpop.f32.mrb[13].mxu0 }
 0x7df   :  { %v1198_v19 = vpop.f32.mrb[14].mxu0 }
 0x7e0   :  { %1204 = vadd.xlane.f32.xlu1 %v1198_v19  ;;  %v1200_v43 = vpop.f32.mrb[15].mxu0 }
 0x86b   :  { %v1203_v48 = vpop.xlane.xlu0 %1202 }
 0x86c   :  { %v1206_v61 = vmul.f32 0.0078125, %v1203_v48 }
 0x86d   :  { %v1205_v51 = vpop.xlane.xlu1 %1204 }
 0x86e   :  { %v1207_v27 = vmul.f32 0.0078125, %v1205_v51  ;;  %v1208_v41 = vsub.f32 %v1195_v52, %v1206_v61 }
 0x870   :  { %v1210_v42 = vmul.f32 %v1208_v41, %v1208_v41  ;;  %v1209_v8 = vsub.f32 %v1198_v19, %v1207_v27 }
 0x872   :  { %1212 = vadd.xlane.f32.xlu0 %v1210_v42  ;;  %v1211_v31 = vmul.f32 %v1209_v8, %v1209_v8 }
 0x876   :  { %1214 = vadd.xlane.f32.xlu0 %v1211_v31 }
 0x8ff   :  { %v1213_v20 = vpop.xlane.xlu0 %1212 }
 0x900   :  { %v1216_v25 = vmul.f32 0.0078125, %v1213_v20 }
 0x902   :  { %v1218_v33 = vadd.f32 1e-05, %v1216_v25 }
 0x903   :  { %v1215_v36 = vpop.xlane.xlu0 %1214 }
 0x904   :  { %2500 = vrsqrt.f32 %v1218_v33  ;;  %v1217_v1 = vmul.f32 0.0078125, %v1215_v36 }
 0x906   :  { %v1219_v50 = vadd.f32 1e-05, %v1217_v1 }
 0x908   :  { %2502 = vrsqrt.f32 %v1219_v50 }
 0x90e   :  { %v2501_v2 = vpop.eup %2500 }
 0x90f   :  { %v1222_v30 = vmul.f32 %v2501_v2, %v1208_v41 }
 0x911   :  { %v1224_v32 = vmax.f32 %v1222_v30, 0.0 }
 0x912   :  { %v2503_v5 = vpop.eup %2502 }
 0x913   :  { %v1223_v10 = vmul.f32 %v2503_v5, %v1209_v8  ;;  %1226 = vrot.lane.b32.xlu1 %v1224_v32, %s2529_s10  ;;  %v3442_v11 = vmul.f32 %v3345_v56, %v1224_v32 }
 0x915   :  { %v1225_v60 = vmax.f32 %v1223_v10, 0.0 }
 0x917   :  { %1232 = vrot.lane.b32.xlu1 %v1224_v32, %s2530_s2  ;;  %1228 = vrot.lane.b32.xlu0 %v1225_v60, %s2529_s10  ;;  %v3445_v12 = vmul.f32 %v3345_v56, %v1225_v60  ;;  %v2479_v56 = vld [vmem:[%s3786_s4 + $0x4] ss:$8 sps:$4 sm:$0xff]  }
 0x918   :  { %2124 = vmatprep.mubr.msk.bf16.mxu1 %vm1157_vm10, %v2479_v56 }
 0x919   :  { %v1280_v0 = vpack.c.bf16 %v3445_v12, %v3442_v11 }
 0x91b   :  { %1234 = vrot.lane.b32.xlu1 %v1225_v60, %s2530_s2  ;;  %1238 = vrot.lane.b32.xlu0 %v1224_v32, %s2531_s21 }
 0x91f   :  { %1240 = vrot.lane.b32.xlu1 %v1225_v60, %s2531_s21  ;;  %1244 = vrot.lane.b32.xlu0 %v1224_v32, %s2523_s14 }
 0x923   :  { %1246 = vrot.lane.b32.xlu1 %v1225_v60, %s2523_s14  ;;  %1252 = vrot.lane.b32.xlu0 %v1224_v32, %s2524_s0 }
 0x927   :  { %1254 = vrot.lane.b32.xlu1 %v1225_v60, %s2524_s0  ;;  %1258 = vrot.lane.b32.xlu0 %v1224_v32, %s2532_s22 }
 0x92b   :  { %1260 = vrot.lane.b32.xlu1 %v1225_v60, %s2532_s22  ;;  %1264 = vrot.lane.b32.xlu0 %v1224_v32, %s2533_s25 }
 0x92f   :  { %1266 = vrot.lane.b32.xlu1 %v1225_v60, %s2533_s25  ;;  %1270 = vrot.lane.b32.xlu0 %v1224_v32, %s2534_s26 }
 0x933   :  { %1272 = vrot.lane.b32.xlu1 %v1225_v60, %s2534_s26 }
 0x985   :  { %v1227_v17 = vpop.permute.xlu1 %1226 }
 0x986   :  { %v1230_v52 = vmul.f32 %v3374_v57, %v1227_v17 }
 0x989   :  { %v1229_v35 = vpop.permute.xlu0 %1228  ;;  %v1233_v49 = vpop.permute.xlu1 %1232 }
 0x98a   :  { %v1231_v53 = vmul.f32 %v3374_v57, %v1229_v35  ;;  %v1236_v61 = vmul.f32 %v3381_v45, %v1233_v49 }
 0x98c   :  { %v1276_v19 = vpack.c.bf16 %v1231_v53, %v1230_v52 }
 0x98d   :  { %v1239_v43 = vpop.permute.xlu0 %1238  ;;  %v1235_v48 = vpop.permute.xlu1 %1234 }
 0x98e   :  { %v1237_v51 = vmul.f32 %v3381_v45, %v1235_v48  ;;  %1314 = vmatpush1.bf16.msra.mxu1 %v1276_v19  ;;  %v1242_v8 = vmul.f32 %v3388_v21, %v1239_v43 }
 0x98f   :  { %1315 = vmatprep.subr.bf16.mxu1 %v2527_v4 }
 0x990   :  { %v1277_v27 = vpack.c.bf16 %v1237_v51, %v1236_v61 }
 0x991   :  { %v1245_v41 = vpop.permute.xlu0 %1244  ;;  %v1241_v42 = vpop.permute.xlu1 %1240 }
 0x992   :  { %v1243_v31 = vmul.f32 %v3388_v21, %v1241_v42  ;;  %1316 = vmatpush1.bf16.msra.mxu1 %v1277_v27  ;;  %v1248_v33 = vmul.f32 %v3396_v22, %v1245_v41 }
 0x993   :  { %1317 = vmatprep.subr.bf16.mxu1 %v2527_v4 }
 0x994   :  { %v1278_v57 = vpack.c.bf16 %v1243_v31, %v1242_v8 }
 0x995   :  { %v1253_v20 = vpop.permute.xlu0 %1252  ;;  %v1247_v25 = vpop.permute.xlu1 %1246 }
 0x996   :  { %v1249_v45 = vmul.f32 %v3396_v22, %v1247_v25  ;;  %1318 = vmatpush1.bf16.msra.mxu1 %v1278_v57  ;;  %v1256_v30 = vmul.f32 %v3405_v39, %v1253_v20 }
 0x997   :  { %1319 = vmatprep.subr.bf16.mxu1 %v2527_v4 }
 0x998   :  { %v1279_v36 = vpack.c.bf16 %v1249_v45, %v1248_v33 }
 0x999   :  { %v1255_v1 = vpop.permute.xlu1 %1254  ;;  %v1259_v50 = vpop.permute.xlu0 %1258 }
 0x99a   :  { %1320 = vmatpush1.bf16.msra.mxu1 %v1279_v36  ;;  %v1257_v21 = vmul.f32 %v3405_v39, %v1255_v1  ;;  %v1262_v60 = vmul.f32 %v3413_v37, %v1259_v50 }
 0x99b   :  { %1321 = vmatprep.subr.bf16.mxu1 %v2527_v4 }
 0x99c   :  { %v1281_v22 = vpack.c.bf16 %v1257_v21, %v1256_v30 }
 0x99d   :  { %v1261_v2 = vpop.permute.xlu1 %1260  ;;  %v1265_v5 = vpop.permute.xlu0 %1264 }
 0x99e   :  { %1322 = vmatpush1.bf16.msra.mxu1 %v1280_v0  ;;  %v1263_v32 = vmul.f32 %v3413_v37, %v1261_v2  ;;  %v1268_v38 = vmul.f32 %v3421_v14, %v1265_v5 }
 0x99f   :  { %1323 = vmatprep.subr.bf16.mxu1 %v2527_v4 }
 0x9a0   :  { %v1282_v56 = vpack.c.bf16 %v1263_v32, %v1262_v60 }
 0x9a1   :  { %v1267_v10 = vpop.permute.xlu1 %1266  ;;  %v1271_v11 = vpop.permute.xlu0 %1270 }
 0x9a2   :  { %1324 = vmatpush1.bf16.msra.mxu1 %v1281_v22  ;;  %v1269_v3 = vmul.f32 %v3421_v14, %v1267_v10  ;;  %v1274_v9 = vmul.f32 %v3429_v62, %v1271_v11  ;;  %v2480_v14 = vld [vmem:[%s3786_s4 + $0x14] ss:$8 sps:$4 sm:$0xff]  }
 0x9a3   :  { %1325 = vmatprep.subr.bf16.mxu1 %v2527_v4 }
 0x9a4   :  { %v1283_v12 = vpack.c.bf16 %v1269_v3, %v1268_v38 }
 0x9a5   :  { %v1273_v39 = vpop.permute.xlu1 %1272 }
 0x9a6   :  { %1326 = vmatpush1.bf16.msra.mxu1 %v1282_v56  ;;  %v1275_v0 = vmul.f32 %v3429_v62, %v1273_v39  ;;  %v2482_v62 = vld [vmem:[%s3786_s4 + $0x10] ss:$8 sps:$4 sm:$0xff]  }
 0x9a7   :  { %1327 = vmatprep.subr.bf16.mxu1 %v2527_v4 }
 0x9a8   :  { %v1284_v37 = vpack.c.bf16 %v1275_v0, %v1274_v9 }
 0x9aa   :  { %1328 = vmatpush1.bf16.msra.mxu1 %v1283_v12 }
 0x9ab   :  { %1329 = vmatprep.subr.bf16.mxu1 %v2527_v4 }
 0x9ae   :  { %1330 = vmatpush1.bf16.msra.mxu1 %v1284_v37 }
 0x9b1   :  { %1346 = vmatmul.mubr.bf16.vlgmr.msra.gmra.mrb[12].mxu1 %v2477_v34 }
 0x9b2   :  { %2125 = vmatprep.mubr.msk.bf16.mxu1 %vm1157_vm10, %v2480_v14 }
 0x9b9   :  { %1354 = vmatmul.mubr.bf16.gmra.mrb[16].mxu1 %v2482_v62  ;;  %v2485_v62 = vld [vmem:[%s3789_s5 + $0x4] ss:$12 sps:$4 sm:$0xff]  }
 0x9ba   :  { %1755 = vmatprep.mubr.bf16.mxu1 %v2485_v62 }
 0xa84   :  { %v1347_v54 = vpop.f32.mrb[12].mxu1 }
 0xa85   :  { %v1349_v4 = vpop.f32.mrb[13].mxu1  ;;  %2332 = vmatprep.mubr.f32.mxu0 %v1347_v54  ;;  %v2489_v54 = vld [vmem:[%s3789_s5 + $0x8] ss:$12 sps:$4 sm:$0xff]  }
 0xa86   :  { %v1350_v44 = vpop.f32.mrb[14].mxu1 }
 0xa87   :  { %v1352_v15 = vpop.f32.mrb[15].mxu1  ;;  %2333 = vmatmul.mubr.f32.vlgmr.msra.gmra.mrb[16].mxu0 %v1350_v44 }
 0xa8c   :  { %v1355_v55 = vpop.f32.mrb[16].mxu1 }
 0xa8d   :  { %v1357_v63 = vpop.f32.mrb[17].mxu1  ;;  %2335 = vmatprep.mubr.f32.mxu0 %v1355_v55 }
 0xa8e   :  { %v1358_v13 = vpop.f32.mrb[18].mxu1 }
 0xa8f   :  { %2336 = vmatmul.mubr.f32.gmra.mrb[18].mxu0 %v1358_v13  ;;  %v1360_v40 = vpop.f32.mrb[19].mxu1 }
 0xa90   :  { %2342 = vmatprep.mubr.msk.bf16.mxu0 %vm1716_vm11, %v2489_v54  ;;  %v3658_v54 = vld [vmem:[%s3788_s9 + $0x3] ss:$0 sm:$0xff] }
 0xb5a   :  { %v2334_v23 = vpop.f32.mrb[16].mxu0 }
 0xb5b   :  { %1465 = vadd.xlane.f32.xlu1 %v2334_v23  ;;  %v1444_v59 = vpop.f32.mrb[17].mxu0 }
 0xb5c   :  { %1463 = vadd.xlane.f32.xlu0 %v1444_v59 }
 0xb62   :  { %v2337_v46 = vpop.f32.mrb[18].mxu0 }
 0xb63   :  { %v1454_v58 = vpop.f32.mrb[19].mxu0 }
 0xb64   :  { %1467 = vadd.xlane.f32.xlu0 %v1454_v58 }
 0xb68   :  { %1469 = vadd.xlane.f32.xlu0 %v2337_v46 }
 0xbe8   :  { %v1466_v6 = vpop.xlane.xlu1 %1465 }
 0xbe9   :  { %v1472_v18 = vmul.f32 0.03125, %v1466_v6  ;;  %v1464_v28 = vpop.xlane.xlu0 %1463 }
 0xbea   :  { %v1471_v29 = vmul.f32 0.03125, %v1464_v28 }
 0xbeb   :  { %v1476_v47 = vsub.f32 %v2334_v23, %v1472_v18 }
 0xbec   :  { %v1475_v26 = vsub.f32 %v1444_v59, %v1471_v29  ;;  %v3606_v59 = vld [vmem:[%s3788_s9] ss:$0 sm:$0xff] }
 0xbed   :  { %v1485_v16 = vmul.f32 %v3554_v24, %v1476_v47 }
 0xbee   :  { %v1484_v7 = vmul.f32 %v3554_v24, %v1475_v26 }
 0xbef   :  { %v1489_v17 = vmul.f32 %v1485_v16, %v1485_v16 }
 0xbf0   :  { %v1488_v35 = vmul.f32 %v1484_v7, %v1484_v7 }
 0xbf1   :  { %1494 = vadd.xlane.f32.xlu0 %v1489_v17  ;;  %v1468_v49 = vpop.xlane.xlu0 %1467 }
 0xbf2   :  { %v1473_v52 = vmul.f32 0.03125, %v1468_v49  ;;  %1492 = vadd.xlane.f32.xlu1 %v1488_v35  ;;  %v3613_v35 = vld [vmem:[%s3788_s9 + $0x5] ss:$0 sm:$0xff] }
 0xbf4   :  { %v1477_v53 = vsub.f32 %v1454_v58, %v1473_v52 }
 0xbf5   :  { %v1470_v19 = vpop.xlane.xlu0 %1469 }
 0xbf6   :  { %v1486_v43 = vmul.f32 %v3554_v24, %v1477_v53  ;;  %v1474_v48 = vmul.f32 0.03125, %v1470_v19 }
 0xbf8   :  { %v1478_v61 = vsub.f32 %v2337_v46, %v1474_v48  ;;  %v1490_v51 = vmul.f32 %v1486_v43, %v1486_v43 }
 0xbfa   :  { %v1487_v27 = vmul.f32 %v3554_v24, %v1478_v61  ;;  %1496 = vadd.xlane.f32.xlu1 %v1490_v51  ;;  %v3622_v61 = vld [vmem:[%s3788_s9 + $0x1] ss:$0 sm:$0xff] }
 0xbfc   :  { %v1491_v41 = vmul.f32 %v1487_v27, %v1487_v27 }
 0xbfe   :  { %1498 = vadd.xlane.f32.xlu0 %v1491_v41 }
 0xc7e   :  { %v1495_v42 = vpop.xlane.xlu0 %1494 }
 0xc7f   :  { %v1501_v8 = vmul.f32 0.03125, %v1495_v42  ;;  %v1493_v31 = vpop.xlane.xlu1 %1492 }
 0xc80   :  { %v1500_v57 = vmul.f32 0.03125, %v1493_v31 }
 0xc81   :  { %v1505_v20 = vadd.f32 1e-05, %v1501_v8 }
 0xc82   :  { %v1504_v25 = vadd.f32 1e-05, %v1500_v57 }
 0xc83   :  { %2504 = vrsqrt.f32 %v1505_v20 }
 0xc84   :  { %2506 = vrsqrt.f32 %v1504_v25  ;;  %v3631_v25 = vld [vmem:[%s3788_s9 + $0x6] ss:$0 sm:$0xff] }
 0xc87   :  { %v1497_v33 = vpop.xlane.xlu1 %1496 }
 0xc88   :  { %v1502_v45 = vmul.f32 0.03125, %v1497_v33 }
 0xc8a   :  { %v1506_v36 = vadd.f32 1e-05, %v1502_v45 }
 0xc8b   :  { %v1499_v1 = vpop.xlane.xlu0 %1498 }
 0xc8c   :  { %2508 = vrsqrt.f32 %v1506_v36  ;;  %v1503_v50 = vmul.f32 0.03125, %v1499_v1 }
 0xc8d   :  { %v2505_v21 = vpop.eup %2504 }
 0xc8e   :  { %v2507_v2 = vpop.eup %2506  ;;  %v1513_v30 = vmul.f32 %v2505_v21, %v1485_v16  ;;  %v1507_v22 = vadd.f32 1e-05, %v1503_v50 }
 0xc8f   :  { %v1512_v32 = vmul.f32 %v2507_v2, %v1484_v7 }
 0xc90   :  { %v1517_v5 = vmax.f32 %v1513_v30, 0.0  ;;  %2510 = vrsqrt.f32 %v1507_v22  ;;  %v3640_v22 = vld [vmem:[%s3788_s9 + $0x2] ss:$0 sm:$0xff] }
 0xc91   :  { %v1516_v10 = vmax.f32 %v1512_v32, 0.0 }
 0xc92   :  { %1594 = vrot.lane.b32.xlu1 %v1517_v5, %s2524_s0  ;;  %1522 = vrot.lane.b32.xlu0 %v1517_v5, %s2535_s20  ;;  %v1589_v60 = vmul.f32 %v3554_v24, %v1517_v5 }
 0xc93   :  { %v1588_v56 = vmul.f32 %v3554_v24, %v1516_v10 }
 0xc95   :  { %v1668_v3 = vpack.c.bf16 %v1589_v60, %v1588_v56 }
 0xc96   :  { %v2509_v39 = vpop.eup %2508  ;;  %1539 = vrot.lane.b32.xlu1 %v1517_v5, %s2536_s7  ;;  %1592 = vrot.lane.b32.xlu0 %v1516_v10, %s2524_s0 }
 0xc97   :  { %v1514_v38 = vmul.f32 %v2509_v39, %v1486_v43  ;;  %2243 = vmatprep.subr.bf16.mxu1 %v1668_v3 }
 0xc99   :  { %v1518_v12 = vmax.f32 %v1514_v38, 0.0 }
 0xc9a   :  { %v2511_v11 = vpop.eup %2510  ;;  %1611 = vrot.lane.b32.xlu1 %v1517_v5, %s2537_s27  ;;  %1537 = vrot.lane.b32.xlu0 %v1516_v10, %s2536_s7 }
 0xc9b   :  { %v1515_v0 = vmul.f32 %v2511_v11, %v1487_v27  ;;  %v1590_v37 = vmul.f32 %v3554_v24, %v1518_v12 }
 0xc9d   :  { %v1519_v9 = vmax.f32 %v1515_v0, 0.0 }
 0xc9e   :  { %1556 = vrot.lane.b32.xlu1 %v1517_v5, %s2538_s1  ;;  %1609 = vrot.lane.b32.xlu0 %v1516_v10, %s2537_s27 }
 0xc9f   :  { %v1591_v34 = vmul.f32 %v3554_v24, %v1519_v9 }
 0xca1   :  { %v1669_v14 = vpack.c.bf16 %v1591_v34, %v1590_v37 }
 0xca2   :  { %1520 = vrot.lane.b32.xlu1 %v1516_v10, %s2535_s20  ;;  %1554 = vrot.lane.b32.xlu0 %v1516_v10, %s2538_s1 }
 0xca6   :  { %1626 = vrot.lane.b32.xlu0 %v1516_v10, %s2539_s23  ;;  %1526 = vrot.lane.b32.xlu1 %v1519_v9, %s2535_s20 }
 0xcaa   :  { %1571 = vrot.lane.b32.xlu0 %v1516_v10, %s2523_s14  ;;  %1598 = vrot.lane.b32.xlu1 %v1519_v9, %s2524_s0 }
 0xcae   :  { %1596 = vrot.lane.b32.xlu0 %v1518_v12, %s2524_s0  ;;  %1543 = vrot.lane.b32.xlu1 %v1519_v9, %s2536_s7 }
 0xcb2   :  { %1541 = vrot.lane.b32.xlu0 %v1518_v12, %s2536_s7  ;;  %1524 = vrot.lane.b32.xlu1 %v1518_v12, %s2535_s20 }
 0xcb6   :  { %1613 = vrot.lane.b32.xlu0 %v1518_v12, %s2537_s27  ;;  %1615 = vrot.lane.b32.xlu1 %v1519_v9, %s2537_s27 }
 0xcba   :  { %1558 = vrot.lane.b32.xlu0 %v1518_v12, %s2538_s1  ;;  %1560 = vrot.lane.b32.xlu1 %v1519_v9, %s2538_s1 }
 0xcbe   :  { %1630 = vrot.lane.b32.xlu0 %v1518_v12, %s2539_s23  ;;  %1628 = vrot.lane.b32.xlu1 %v1517_v5, %s2539_s23 }
 0xcc2   :  { %1575 = vrot.lane.b32.xlu0 %v1518_v12, %s2523_s14  ;;  %1573 = vrot.lane.b32.xlu1 %v1517_v5, %s2523_s14 }
 0xcc6   :  { %1643 = vrot.lane.b32.xlu0 %v1516_v10, %s2540_s8  ;;  %1632 = vrot.lane.b32.xlu1 %v1519_v9, %s2539_s23 }
 0xcca   :  { %1647 = vrot.lane.b32.xlu0 %v1518_v12, %s2540_s8  ;;  %1577 = vrot.lane.b32.xlu1 %v1519_v9, %s2523_s14  ;;  %v3649_v12 = vld [vmem:[%s3788_s9 + $0x7] ss:$0 sm:$0xff] }
 0xcce   :  { %1645 = vrot.lane.b32.xlu1 %v1517_v5, %s2540_s8 }
 0xcd2   :  { %1649 = vrot.lane.b32.xlu1 %v1519_v9, %s2540_s8 }
 0xd04   :  { %v1595_v4 = vpop.permute.xlu1 %1594  ;;  %v1523_v44 = vpop.permute.xlu0 %1522 }
 0xd05   :  { %v1534_v6 = vmul.f32 %v3606_v59, %v1523_v44  ;;  %v1606_v48 = vmul.f32 %v3613_v35, %v1595_v4 }
 0xd08   :  { %v1540_v15 = vpop.permute.xlu1 %1539  ;;  %v1593_v55 = vpop.permute.xlu0 %1592 }
 0xd09   :  { %v1605_v49 = vmul.f32 %v3613_v35, %v1593_v55  ;;  %v1551_v57 = vmul.f32 %v3622_v61, %v1540_v15 }
 0xd0b   :  { %v1670_v41 = vpack.c.bf16 %v1606_v48, %v1605_v49 }
 0xd0c   :  { %v1612_v63 = vpop.permute.xlu1 %1611  ;;  %v1538_v13 = vpop.permute.xlu0 %1537 }
 0xd0d   :  { %v1550_v51 = vmul.f32 %v3622_v61, %v1538_v13  ;;  %v1623_v30 = vmul.f32 %v3631_v25, %v1612_v63 }
 0xd0f   :  { %v1662_v33 = vpack.c.bf16 %v1551_v57, %v1550_v51 }
 0xd10   :  { %v1557_v40 = vpop.permute.xlu1 %1556  ;;  %v1610_v23 = vpop.permute.xlu0 %1609 }
 0xd11   :  { %v1622_v36 = vmul.f32 %v3631_v25, %v1610_v23  ;;  %v1568_v38 = vmul.f32 %v3640_v22, %v1557_v40 }
 0xd13   :  { %v1672_v10 = vpack.c.bf16 %v1623_v30, %v1622_v36 }
 0xd14   :  { %v1521_v46 = vpop.permute.xlu1 %1520  ;;  %v1555_v58 = vpop.permute.xlu0 %1554 }
 0xd15   :  { %v1533_v18 = vmul.f32 %v3606_v59, %v1521_v46  ;;  %v1567_v32 = vmul.f32 %v3640_v22, %v1555_v58 }
 0xd17   :  { %v1660_v28 = vpack.c.bf16 %v1534_v6, %v1533_v18  ;;  %v1664_v11 = vpack.c.bf16 %v1568_v38, %v1567_v32 }
 0xd18   :  { %v1527_v29 = vpop.permute.xlu1 %1526  ;;  %v1627_v47 = vpop.permute.xlu0 %1626 }
 0xd19   :  { %2244 = vmatpush3.bf16.msra.mxu1 %v1660_v28  ;;  %v1536_v19 = vmul.f32 %v3606_v59, %v1527_v29  ;;  %v1639_v62 = vmul.f32 %v3649_v12, %v1627_v47  ;;  %v3669_v47 = vld [vmem:[%s3788_s9 + $0x8] ss:$0 sm:$0xff] }
 0xd1a   :  { %2245 = vmatprep.subr.bf16.mxu1 %v1669_v14 }
 0xd1c   :  { %v1599_v26 = vpop.permute.xlu1 %1598  ;;  %v1572_v16 = vpop.permute.xlu0 %1571 }
 0xd1d   :  { %v1608_v20 = vmul.f32 %v3613_v35, %v1599_v26  ;;  %v1584_v13 = vmul.f32 %v3658_v54, %v1572_v16 }
 0xd20   :  { %v1544_v7 = vpop.permute.xlu1 %1543  ;;  %v1597_v17 = vpop.permute.xlu0 %1596 }
 0xd21   :  { %v1607_v42 = vmul.f32 %v3613_v35, %v1597_v17  ;;  %v1553_v2 = vmul.f32 %v3622_v61, %v1544_v7  ;;  %v2483_v7 = vld [vmem:[%s3789_s5] ss:$12 sps:$4 sm:$0xff]  }
 0xd23   :  { %v1671_v1 = vpack.c.bf16 %v1608_v20, %v1607_v42  ;;  %v2490_v42 = vld [vmem:[%s3789_s5 + $0x20] ss:$12 sps:$4 sm:$0xff]  }
 0xd24   :  { %v1525_v52 = vpop.permute.xlu1 %1524  ;;  %v1542_v53 = vpop.permute.xlu0 %1541 }
 0xd25   :  { %v1535_v43 = vmul.f32 %v3606_v59, %v1525_v52  ;;  %v1552_v45 = vmul.f32 %v3622_v61, %v1542_v53  ;;  %v2486_v52 = vld [vmem:[%s3789_s5 + $0x1c] ss:$12 sps:$4 sm:$0xff]  }
 0xd27   :  { %v1661_v27 = vpack.c.bf16 %v1536_v19, %v1535_v43  ;;  %v1663_v5 = vpack.c.bf16 %v1553_v2, %v1552_v45 }
 0xd28   :  { %v1616_v8 = vpop.permute.xlu1 %1615  ;;  %v1614_v31 = vpop.permute.xlu0 %1613 }
 0xd29   :  { %2246 = vmatpush3.bf16.msra.mxu1 %v1661_v27  ;;  %v1625_v60 = vmul.f32 %v3631_v25, %v1616_v8  ;;  %v1624_v56 = vmul.f32 %v3631_v25, %v1614_v31 }
 0xd2a   :  { %2247 = vmatprep.subr.bf16.mxu1 %v1670_v41  ;;  %v2488_v41 = vld [vmem:[%s3789_s5 + $0x18] ss:$12 sps:$4 sm:$0xff]  }
 0xd2b   :  { %v1673_v37 = vpack.c.bf16 %v1625_v60, %v1624_v56 }
 0xd2c   :  { %v1561_v50 = vpop.permute.xlu1 %1560  ;;  %v1559_v21 = vpop.permute.xlu0 %1558 }
 0xd2d   :  { %2248 = vmatpush3.bf16.msra.mxu1 %v1662_v33  ;;  %v1570_v0 = vmul.f32 %v3640_v22, %v1561_v50  ;;  %v1569_v9 = vmul.f32 %v3640_v22, %v1559_v21 }
 0xd2e   :  { %2249 = vmatprep.subr.bf16.mxu1 %v1671_v1 }
 0xd2f   :  { %v1665_v44 = vpack.c.bf16 %v1570_v0, %v1569_v9 }
 0xd30   :  { %v1629_v3 = vpop.permute.xlu1 %1628  ;;  %v1631_v39 = vpop.permute.xlu0 %1630 }
 0xd31   :  { %2250 = vmatpush3.bf16.msra.mxu1 %v1663_v5  ;;  %v1640_v34 = vmul.f32 %v3649_v12, %v1629_v3  ;;  %v1641_v40 = vmul.f32 %v3649_v12, %v1631_v39 }
 0xd32   :  { %2251 = vmatprep.subr.bf16.mxu1 %v1672_v10 }
 0xd33   :  { %v1674_v55 = vpack.c.bf16 %v1640_v34, %v1639_v62 }
 0xd34   :  { %v1574_v14 = vpop.permute.xlu1 %1573  ;;  %v1576_v4 = vpop.permute.xlu0 %1575 }
 0xd35   :  { %2252 = vmatpush3.bf16.msra.mxu1 %v1664_v11  ;;  %v1585_v15 = vmul.f32 %v3658_v54, %v1574_v14  ;;  %v1586_v28 = vmul.f32 %v3658_v54, %v1576_v4 }
 0xd36   :  { %2253 = vmatprep.subr.bf16.mxu1 %v1673_v37 }
 0xd37   :  { %v1666_v46 = vpack.c.bf16 %v1585_v15, %v1584_v13 }
 0xd38   :  { %v1633_v63 = vpop.permute.xlu1 %1632  ;;  %v1644_v6 = vpop.permute.xlu0 %1643 }
 0xd39   :  { %v1642_v23 = vmul.f32 %v3649_v12, %v1633_v63  ;;  %2254 = vmatpush3.bf16.msra.mxu1 %v1665_v44  ;;  %v1656_v17 = vmul.f32 %v3669_v47, %v1644_v6 }
 0xd3a   :  { %2255 = vmatprep.subr.bf16.mxu1 %v1674_v55 }
 0xd3b   :  { %v1675_v58 = vpack.c.bf16 %v1642_v23, %v1641_v40 }
 0xd3c   :  { %v1578_v18 = vpop.permute.xlu1 %1577  ;;  %v1648_v53 = vpop.permute.xlu0 %1647 }
 0xd3d   :  { %v1587_v29 = vmul.f32 %v3658_v54, %v1578_v18  ;;  %2256 = vmatpush3.bf16.msra.mxu1 %v1666_v46  ;;  %v1658_v48 = vmul.f32 %v3669_v47, %v1648_v53 }
 0xd3e   :  { %2257 = vmatprep.subr.bf16.mxu1 %v1675_v58 }
 0xd3f   :  { %v1667_v26 = vpack.c.bf16 %v1587_v29, %v1586_v28 }
 0xd40   :  { %v1646_v16 = vpop.permute.xlu1 %1645 }
 0xd41   :  { %v1657_v49 = vmul.f32 %v3669_v47, %v1646_v16  ;;  %2258 = vmatpush3.bf16.msra.mxu1 %v1667_v26 }
 0xd43   :  { %v1676_v19 = vpack.c.bf16 %v1657_v49, %v1656_v17 }
 0xd44   :  { %v1650_v43 = vpop.permute.xlu1 %1649  ;;  %1756 = vmatmul.mubr.bf16.vlgmr.msra.gmra.mrb[20].mxu1 %v2483_v7 }
 0xd45   :  { %v1659_v51 = vmul.f32 %v3669_v47, %v1650_v43  ;;  %2338 = vmatprep.subr.bf16.mxu0 %v1676_v19  ;;  %1763 = vmatprep.mubr.bf16.mxu1 %v2486_v52 }
 0xd46   :  { %2339 = vmatpush3.bf16.msra.mxu0 %v1676_v19 }
 0xd47   :  { %v1677_v27 = vpack.c.bf16 %v1659_v51, %v1658_v48 }
 0xd49   :  { %2340 = vmatprep.subr.bf16.mxu0 %v1677_v27 }
 0xd4a   :  { %2341 = vmatpush3.bf16.msra.mxu0 %v1677_v27 }
 0xd4c   :  { %1764 = vmatmul.mubr.bf16.gmra.mrb[24].mxu1 %v2488_v41 }
 0xd4d   :  { %2343 = vmatmul.mubr.msk.bf16.vlgmr.msra.gmra.mrb[20].mxu0 %vm1716_vm11, %v2490_v42 }
 0xe17   :  { %v2259_v8 = vpop.f32.mrb[20].mxu1 }
 0xe18   :  { %v2260_v31 = vpop.f32.mrb[21].mxu1 }
 0xe19   :  { %v2261_v57 = vadd.f32 %v2260_v31, %v2259_v8  ;;  %v2262_v20 = vpop.f32.mrb[22].mxu1 }
 0xe1a   :  { %v2263_v33 = vpop.f32.mrb[23].mxu1 }
 0xe1b   :  { %v2264_v45 = vadd.f32 %v2263_v33, %v2262_v20 }
 0xe1f   :  { %v2265_v36 = vpop.f32.mrb[24].mxu1 }
 0xe20   :  { %v2266_v1 = vpop.f32.mrb[25].mxu1  ;;  %v2344_v50 = vpop.f32.mrb[20].mxu0 }
 0xe21   :  { %v2267_v21 = vadd.f32 %v2266_v1, %v2265_v36  ;;  %v2268_v2 = vpop.f32.mrb[26].mxu1  ;;  %v1806_v30 = vpop.f32.mrb[21].mxu0 }
 0xe22   :  { %v1807_v32 = vadd.f32 %v2261_v57, %v1806_v30  ;;  %v2269_v5 = vpop.f32.mrb[27].mxu1  ;;  %v2345_v10 = vpop.f32.mrb[22].mxu0 }
 0xe23   :  { %v1815_v60 = vadd.f32 %v2344_v50, %v2267_v21  ;;  %v2270_v56 = vadd.f32 %v2269_v5, %v2268_v2  ;;  %v1809_v3 = vpop.f32.mrb[23].mxu0 }
 0xe24   :  { %v1810_v39 = vadd.f32 %v2264_v45, %v1809_v3  ;;  %1821 = vadd.xlane.f32.xlu0 %v1807_v32 }
 0xe25   :  { %v1818_v38 = vadd.f32 %v2345_v10, %v2270_v56 }
 0xe26   :  { %1823 = vadd.xlane.f32.xlu1 %v1810_v39 }
 0xe28   :  { %1825 = vadd.xlane.f32.xlu0 %v1815_v60 }
 0xe2c   :  { %1827 = vadd.xlane.f32.xlu0 %v1818_v38 }
 0xeb1   :  { %v1822_v11 = vpop.xlane.xlu0 %1821 }
 0xeb2   :  { %v1829_v0 = vmul.f32 0.03125, %v1822_v11 }
 0xeb3   :  { %v1824_v9 = vpop.xlane.xlu1 %1823 }
 0xeb4   :  { %v1833_v37 = vsub.f32 %v1807_v32, %v1829_v0  ;;  %v1830_v34 = vmul.f32 0.03125, %v1824_v9 }
 0xeb5   :  { %v1826_v14 = vpop.xlane.xlu0 %1825 }
 0xeb6   :  { %v1837_v62 = vmul.f32 %v3554_v24, %v1833_v37  ;;  %v1834_v4 = vsub.f32 %v1810_v39, %v1830_v34  ;;  %v1831_v44 = vmul.f32 0.03125, %v1826_v14 }
 0xeb8   :  { %v1838_v15 = vmul.f32 %v3554_v24, %v1834_v4  ;;  %v1835_v55 = vsub.f32 %v1815_v60, %v1831_v44  ;;  %v1841_v63 = vmul.f32 %v1837_v62, %v1837_v62  ;;  %v2541_v60 = vmov 0.0  }
 0xeb9   :  { %v1828_v13 = vpop.xlane.xlu0 %1827  ;;  %2346 = vmatprep.subr.bf16.mxu0 %v2541_v60  ;;  %2350 = vmatprep.mubr.msk.bf16.mxu0 %vm2542_vm12, %v2541_v60 }
 0xeba   :  { %v1839_v40 = vmul.f32 %v3554_v24, %v1835_v55  ;;  %v1832_v23 = vmul.f32 0.03125, %v1828_v13  ;;  %1845 = vadd.xlane.f32.xlu1 %v1841_v63  ;;  %v1842_v46 = vmul.f32 %v1838_v15, %v1838_v15 }
 0xebc   :  { %v1836_v58 = vsub.f32 %v1818_v38, %v1832_v23  ;;  %1847 = vadd.xlane.f32.xlu0 %v1842_v46  ;;  %v1843_v6 = vmul.f32 %v1839_v40, %v1839_v40 }
 0xebe   :  { %v1840_v18 = vmul.f32 %v3554_v24, %v1836_v58  ;;  %1849 = vadd.xlane.f32.xlu1 %v1843_v6 }
 0xec0   :  { %v1844_v28 = vmul.f32 %v1840_v18, %v1840_v18 }
 0xec2   :  { %1851 = vadd.xlane.f32.xlu0 %v1844_v28 }
 0xf47   :  { %v1846_v29 = vpop.xlane.xlu1 %1845 }
 0xf48   :  { %v1853_v26 = vmul.f32 0.03125, %v1846_v29 }
 0xf49   :  { %v1848_v16 = vpop.xlane.xlu0 %1847 }
 0xf4a   :  { %v1857_v7 = vadd.f32 1e-05, %v1853_v26  ;;  %v1854_v17 = vmul.f32 0.03125, %v1848_v16 }
 0xf4b   :  { %v1850_v49 = vpop.xlane.xlu1 %1849 }
 0xf4c   :  { %2512 = vrsqrt.f32 %v1857_v7  ;;  %v1858_v52 = vadd.f32 1e-05, %v1854_v17  ;;  %v1855_v53 = vmul.f32 0.03125, %v1850_v49 }
 0xf4e   :  { %2514 = vrsqrt.f32 %v1858_v52  ;;  %v1859_v19 = vadd.f32 1e-05, %v1855_v53 }
 0xf4f   :  { %v1852_v43 = vpop.xlane.xlu0 %1851 }
 0xf50   :  { %2516 = vrsqrt.f32 %v1859_v19  ;;  %v1856_v48 = vmul.f32 0.03125, %v1852_v43 }
 0xf52   :  { %v1860_v51 = vadd.f32 1e-05, %v1856_v48 }
 0xf54   :  { %2518 = vrsqrt.f32 %v1860_v51 }
 0xf56   :  { %v2513_v27 = vpop.eup %2512 }
 0xf57   :  { %v1865_v41 = vmul.f32 %v2513_v27, %v1837_v62 }
 0xf58   :  { %v2515_v42 = vpop.eup %2514 }
 0xf59   :  { %v1869_v8 = vmax.f32 %v1865_v41, 0.0  ;;  %v1866_v31 = vmul.f32 %v2515_v42, %v1838_v15 }
 0xf5a   :  { %v2517_v57 = vpop.eup %2516 }
 0xf5b   :  { %v1870_v20 = vmax.f32 %v1866_v31, 0.0  ;;  %v1867_v33 = vmul.f32 %v2517_v57, %v1839_v40  ;;  %1873 = vrot.lane.b32.xlu1 %v1869_v8, %s2535_s20  ;;  %1925 = vrot.lane.b32.xlu0 %v1869_v8, %s2524_s0  ;;  %v1921_v45 = vmul.f32 %v3554_v24, %v1869_v8 }
 0xf5d   :  { %v1922_v36 = vmul.f32 %v3554_v24, %v1870_v20  ;;  %v1871_v50 = vmax.f32 %v1867_v33, 0.0 }
 0xf5e   :  { %v2519_v1 = vpop.eup %2518 }
 0xf5f   :  { %v1868_v21 = vmul.f32 %v2519_v1, %v1840_v18  ;;  %1885 = vrot.lane.b32.xlu0 %v1869_v8, %s2536_s7  ;;  %1927 = vrot.lane.b32.xlu1 %v1870_v20, %s2524_s0  ;;  %v1981_v2 = vpack.c.bf16 %v1922_v36, %v1921_v45  ;;  %v1923_v32 = vmul.f32 %v3554_v24, %v1871_v50 }
 0xf61   :  { %v1872_v30 = vmax.f32 %v1868_v21, 0.0  ;;  %2275 = vmatprep.subr.bf16.mxu1 %v1981_v2 }
 0xf63   :  { %1937 = vrot.lane.b32.xlu0 %v1869_v8, %s2537_s27  ;;  %1887 = vrot.lane.b32.xlu1 %v1870_v20, %s2536_s7  ;;  %v1924_v5 = vmul.f32 %v3554_v24, %v1872_v30  ;;  %v3725_v24 = vld [vmem:[%s3790_s6] sm:$0xff] }
 0xf64   :  { %v2144_v56 = vcombine.high %v3725_v24, %v3725_v24 }
 0xf65   :  { %v1982_v10 = vpack.c.bf16 %v1924_v5, %v1923_v32 }
 0xf66   :  { %2038 = vmatprep.mubr.bf16.mxu1 %v2144_v56 }
 0xf67   :  { %1897 = vrot.lane.b32.xlu0 %v1869_v8, %s2538_s1  ;;  %1939 = vrot.lane.b32.xlu1 %v1870_v20, %s2537_s27 }
 0xf6b   :  { %1949 = vrot.lane.b32.xlu0 %v1869_v8, %s2539_s23  ;;  %1899 = vrot.lane.b32.xlu1 %v1870_v20, %s2538_s1 }
 0xf6f   :  { %1909 = vrot.lane.b32.xlu0 %v1869_v8, %s2523_s14  ;;  %1951 = vrot.lane.b32.xlu1 %v1870_v20, %s2539_s23 }
 0xf73   :  { %1911 = vrot.lane.b32.xlu1 %v1870_v20, %s2523_s14  ;;  %1875 = vrot.lane.b32.xlu0 %v1870_v20, %s2535_s20 }
 0xf77   :  { %1963 = vrot.lane.b32.xlu1 %v1870_v20, %s2540_s8  ;;  %1961 = vrot.lane.b32.xlu0 %v1869_v8, %s2540_s8 }
 0xf7b   :  { %1877 = vrot.lane.b32.xlu1 %v1871_v50, %s2535_s20  ;;  %1929 = vrot.lane.b32.xlu0 %v1871_v50, %s2524_s0 }
 0xf7f   :  { %1889 = vrot.lane.b32.xlu0 %v1871_v50, %s2536_s7  ;;  %1879 = vrot.lane.b32.xlu1 %v1872_v30, %s2535_s20 }
 0xf83   :  { %1941 = vrot.lane.b32.xlu0 %v1871_v50, %s2537_s27  ;;  %1931 = vrot.lane.b32.xlu1 %v1872_v30, %s2524_s0 }
 0xf87   :  { %1901 = vrot.lane.b32.xlu0 %v1871_v50, %s2538_s1  ;;  %1891 = vrot.lane.b32.xlu1 %v1872_v30, %s2536_s7 }
 0xf8b   :  { %1953 = vrot.lane.b32.xlu0 %v1871_v50, %s2539_s23  ;;  %1943 = vrot.lane.b32.xlu1 %v1872_v30, %s2537_s27 }
 0xf8f   :  { %1913 = vrot.lane.b32.xlu0 %v1871_v50, %s2523_s14  ;;  %1903 = vrot.lane.b32.xlu1 %v1872_v30, %s2538_s1 }
 0xf93   :  { %1965 = vrot.lane.b32.xlu0 %v1871_v50, %s2540_s8  ;;  %1955 = vrot.lane.b32.xlu1 %v1872_v30, %s2539_s23 }
 0xf97   :  { %1915 = vrot.lane.b32.xlu1 %v1872_v30, %s2523_s14 }
 0xf9b   :  { %1967 = vrot.lane.b32.xlu1 %v1872_v30, %s2540_s8 }
 0xfcd   :  { %v1874_v3 = vpop.permute.xlu1 %1873  ;;  %v1926_v39 = vpop.permute.xlu0 %1925 }
 0xfce   :  { %v1881_v63 = vmul.f32 %v3606_v59, %v1874_v3  ;;  %v1933_v52 = vmul.f32 %v3613_v35, %v1926_v39 }
 0xfd1   :  { %v1928_v38 = vpop.permute.xlu1 %1927  ;;  %v1886_v11 = vpop.permute.xlu0 %1885 }
 0xfd2   :  { %v1934_v26 = vmul.f32 %v3613_v35, %v1928_v38  ;;  %v1893_v27 = vmul.f32 %v3622_v61, %v1886_v11 }
 0xfd4   :  { %v1983_v43 = vpack.c.bf16 %v1934_v26, %v1933_v52 }
 0xfd5   :  { %v1888_v0 = vpop.permute.xlu1 %1887  ;;  %v1938_v9 = vpop.permute.xlu0 %1937 }
 0xfd6   :  { %v1894_v53 = vmul.f32 %v3622_v61, %v1888_v0  ;;  %v1945_v36 = vmul.f32 %v3631_v25, %v1938_v9 }
 0xfd8   :  { %v1975_v8 = vpack.c.bf16 %v1894_v53, %v1893_v27 }
 0xfd9   :  { %v1940_v37 = vpop.permute.xlu1 %1939  ;;  %v1898_v34 = vpop.permute.xlu0 %1897 }
 0xfda   :  { %v1905_v2 = vmul.f32 %v3640_v22, %v1898_v34 }
 0xfdd   :  { %v1900_v14 = vpop.permute.xlu1 %1899  ;;  %v1950_v62 = vpop.permute.xlu0 %1949 }
 0xfde   :  { %v1906_v1 = vmul.f32 %v3640_v22, %v1900_v14  ;;  %v1957_v38 = vmul.f32 %v3649_v12, %v1950_v62 }
 0xfe1   :  { %v1952_v4 = vpop.permute.xlu1 %1951  ;;  %v3735_v44 = vpop.permute.xlu0 %1909 }
 0xfe2   :  { %v1917_v34 = vmul.f32 %v3658_v54, %v3735_v44  ;;  %v2143_v44 = vcombine.low %v3725_v24, %v3725_v24 }
 0xfe5   :  { %v1912_v15 = vpop.permute.xlu1 %1911  ;;  %v1876_v55 = vpop.permute.xlu0 %1875 }
 0xfe6   :  { %v1882_v13 = vmul.f32 %v3606_v59, %v1876_v55  ;;  %v1918_v11 = vmul.f32 %v3658_v54, %v1912_v15 }
 0xfe8   :  { %v1973_v40 = vpack.c.bf16 %v1882_v13, %v1881_v63 }
 0xfe9   :  { %v1964_v23 = vpop.permute.xlu1 %1963  ;;  %v1962_v46 = vpop.permute.xlu0 %1961 }
 0xfea   :  { %v1970_v58 = vmul.f32 %v3669_v47, %v1964_v23  ;;  %v1969_v6 = vmul.f32 %v3669_v47, %v1962_v46  ;;  %2276 = vmatpush3.bf16.msra.mxu1 %v1973_v40 }
 0xfeb   :  { %2277 = vmatprep.subr.bf16.mxu1 %v1982_v10  ;;  %v1977_v10 = vpack.c.bf16 %v1906_v1, %v1905_v2 }
 0xfec   :  { %v1989_v18 = vpack.c.bf16 %v1970_v58, %v1969_v6  ;;  %v2493_v6 = vld [vmem:[%s3790_s6 + $0x8] ss:$0 sps:$4 sm:$0xff]  }
 0xfed   :  { %v1878_v28 = vpop.permute.xlu1 %1877  ;;  %v1930_v29 = vpop.permute.xlu0 %1929 }
 0xfee   :  { %2347 = vmatpush3.bf16.msra.mxu0 %v1989_v18  ;;  %v1883_v17 = vmul.f32 %v3606_v59, %v1878_v28  ;;  %v1935_v41 = vmul.f32 %v3613_v35, %v1930_v29 }
 0xfef   :  { %2348 = vmatprep.subr.bf16.mxu0 %v2541_v60  ;;  %v1958_v60 = vmul.f32 %v3649_v12, %v1952_v4 }
 0xff1   :  { %v1880_v16 = vpop.permute.xlu1 %1879  ;;  %v1890_v7 = vpop.permute.xlu0 %1889 }
 0xff2   :  { %v1884_v49 = vmul.f32 %v3606_v59, %v1880_v16  ;;  %v1946_v59 = vmul.f32 %v3631_v25, %v1940_v37  ;;  %v1895_v33 = vmul.f32 %v3622_v61, %v1890_v7 }
 0xff4   :  { %v1974_v19 = vpack.c.bf16 %v1884_v49, %v1883_v17 }
 0xff5   :  { %v1932_v48 = vpop.permute.xlu1 %1931  ;;  %v1942_v51 = vpop.permute.xlu0 %1941 }
 0xff6   :  { %v1936_v42 = vmul.f32 %v3613_v35, %v1932_v48  ;;  %2278 = vmatpush3.bf16.msra.mxu1 %v1974_v19  ;;  %v1985_v35 = vpack.c.bf16 %v1946_v59, %v1945_v36  ;;  %v1947_v30 = vmul.f32 %v3631_v25, %v1942_v51 }
 0xff7   :  { %2279 = vmatprep.subr.bf16.mxu1 %v1983_v43 }
 0xff8   :  { %v1984_v31 = vpack.c.bf16 %v1936_v42, %v1935_v41 }
 0xff9   :  { %v1892_v57 = vpop.permute.xlu1 %1891  ;;  %v1902_v20 = vpop.permute.xlu0 %1901 }
 0xffa   :  { %v1896_v45 = vmul.f32 %v3622_v61, %v1892_v57  ;;  %2280 = vmatpush3.bf16.msra.mxu1 %v1975_v8  ;;  %v1907_v3 = vmul.f32 %v3640_v22, %v1902_v20 }
 0xffb   :  { %2281 = vmatprep.subr.bf16.mxu1 %v1984_v31 }
 0xffc   :  { %v1976_v50 = vpack.c.bf16 %v1896_v45, %v1895_v33 }
 0xffd   :  { %v1944_v21 = vpop.permute.xlu1 %1943  ;;  %v1954_v5 = vpop.permute.xlu0 %1953 }
 0xffe   :  { %v1948_v32 = vmul.f32 %v3631_v25, %v1944_v21  ;;  %2282 = vmatpush3.bf16.msra.mxu1 %v1976_v50  ;;  %v1987_v25 = vpack.c.bf16 %v1958_v60, %v1957_v38  ;;  %v1959_v14 = vmul.f32 %v3649_v12, %v1954_v5 }
 0xfff   :  { %2283 = vmatprep.subr.bf16.mxu1 %v1985_v35 }
0x1000   :  { %v1986_v61 = vpack.c.bf16 %v1948_v32, %v1947_v30 }
0x1001   :  { %v1904_v56 = vpop.permute.xlu1 %1903  ;;  %v1914_v9 = vpop.permute.xlu0 %1913 }
0x1002   :  { %v1908_v39 = vmul.f32 %v3640_v22, %v1904_v56  ;;  %2284 = vmatpush3.bf16.msra.mxu1 %v1977_v10  ;;  %v1979_v22 = vpack.c.bf16 %v1918_v11, %v1917_v34  ;;  %v1919_v62 = vmul.f32 %v3658_v54, %v1914_v9 }
0x1003   :  { %2285 = vmatprep.subr.bf16.mxu1 %v1986_v61 }
0x1004   :  { %v1978_v0 = vpack.c.bf16 %v1908_v39, %v1907_v3 }
0x1005   :  { %v1956_v37 = vpop.permute.xlu1 %1955  ;;  %v1966_v13 = vpop.permute.xlu0 %1965 }
0x1006   :  { %v1960_v4 = vmul.f32 %v3649_v12, %v1956_v37  ;;  %2286 = vmatpush3.bf16.msra.mxu1 %v1978_v0  ;;  %v1971_v46 = vmul.f32 %v3669_v47, %v1966_v13 }
0x1007   :  { %2287 = vmatprep.subr.bf16.mxu1 %v1987_v25 }
0x1008   :  { %v1988_v55 = vpack.c.bf16 %v1960_v4, %v1959_v14 }
0x1009   :  { %v1916_v63 = vpop.permute.xlu1 %1915 }
0x100a   :  { %v1920_v15 = vmul.f32 %v3658_v54, %v1916_v63  ;;  %2288 = vmatpush3.bf16.msra.mxu1 %v1979_v22 }
0x100b   :  { %2289 = vmatprep.subr.bf16.mxu1 %v1988_v55 }
0x100c   :  { %v1980_v40 = vpack.c.bf16 %v1920_v15, %v1919_v62 }
0x100d   :  { %v1968_v23 = vpop.permute.xlu1 %1967 }
0x100e   :  { %v1972_v12 = vmul.f32 %v3669_v47, %v1968_v23  ;;  %2290 = vmatpush3.bf16.msra.mxu1 %v1980_v40 }
0x1010   :  { %v1990_v58 = vpack.c.bf16 %v1972_v12, %v1971_v46 }
0x1011   :  { %2039 = vmatmul.mubr.bf16.vlgmr.msra.gmra.mrb[28].mxu1 %v2143_v44 }
0x1012   :  { %2349 = vmatpush3.bf16.msra.mxu0 %v1990_v58 }
0x1015   :  { %2351 = vmatmul.mubr.msk.bf16.vlgmr.msra.gmra.mrb[24].mxu0 %vm1716_vm11, %v2493_v6 }
0x10e4   :  { %v2291_v54 = vpop.f32.mrb[28].mxu1 }
0x10e5   :  { %v2292_v18 = vpop.f32.mrb[29].mxu1 }
0x10e6   :  { %v2293_v28 = vadd.f32 %v2292_v18, %v2291_v54  ;;  %v2294_v29 = vpop.f32.mrb[30].mxu1 }
0x10e7   :  { %v2295_v26 = vpop.f32.mrb[31].mxu1 }
0x10e8   :  { %v2080_v24 = vpop.f32.mrb[24].mxu0 }
0x10e9   :  { %v2081_v16 = vadd.f32 %v2293_v28, %v2080_v24  ;;  %v2352_v7 = vpop.f32.mrb[25].mxu0 }
0x10ea   :  { %v2083_v17 = vpop.f32.mrb[26].mxu0 }
0x10eb   :  { %2086 = vst [vmem:[%s3791_s12] sm:$0xff] %v2081_v16  ;;  %v2353_v47 = vpop.f32.mrb[27].mxu0 }

</bundles_post_ra>
